<compile_context>
chip_gen: v5e
topology: v5e:2x2
jax: 0.10.0
libtpu: 0.0.40
codegen_flags: <defaults>
</compile_context>

<pallas_src>
import jax
import jax.numpy as jnp
from jax.experimental import pallas as pl
from jax.experimental.pallas import tpu as pltpu


_LANE = 128


def _round_up(n, m):
    return ((n + m - 1) // m) * m


def _pad2d(a, rows, cols):
    pr, pc = rows - a.shape[0], cols - a.shape[1]
    if pr == 0 and pc == 0:
        return a
    return jnp.pad(a, ((0, pr), (0, pc)))


def _full_spec(shape):
    n = len(shape)
    return pl.BlockSpec(shape, lambda i, _n=n: (0,) * _n)


# ----------------------------------------------------------------------------
# Fused Pallas kernel: encoder -> (mu, std) -> z = mu + std*eps -> decoder
# ----------------------------------------------------------------------------

def _vae_fused_kernel(
    x_ref, eps_ref,
    ew1_ref, eb1_ref, ew2m_ref, eb2m_ref, ew2v_ref, eb2v_ref,
    dw1_ref, db1_ref, dw2m_ref, db2m_ref, dw2v_ref, db2v_ref,
    qz_mu_ref, qz_std_ref, zs_ref, px_mu_ref, px_std_ref,
):
    """encoder:  h      = relu(x @ EW1 + eb1)
                 qz_mu  = h @ EW2_mu + eb2_mu
                 qz_std = exp(0.5 * (h @ EW2_lv + eb2_lv))
       rsample:  z      = qz_mu + qz_std * eps        (eps is [K*B, Lp])
       decoder:  hd     = relu(z @ DW1 + db1)
                 px_mu  = hd @ DW2_mu + db2_mu
                 px_std = exp(0.5 * (hd @ DW2_lv + db2_lv))
    """
    mxu_dt = ew1_ref.dtype   # bf16 weights -> bf16 MXU inputs, f32 accumulate

    # ---- encoder ----
    x = x_ref[...].astype(mxu_dt)                                      # [B, Dp]
    h = jnp.dot(x, ew1_ref[...], preferred_element_type=jnp.float32)
    h = jnp.maximum(h + eb1_ref[...], 0.0)                             # [B, Hp] f32
    hb = h.astype(mxu_dt)
    qz_mu = (jnp.dot(hb, ew2m_ref[...], preferred_element_type=jnp.float32)
             + eb2m_ref[...])                                          # [B, Lp]
    qz_lv = (jnp.dot(hb, ew2v_ref[...], preferred_element_type=jnp.float32)
             + eb2v_ref[...])
    qz_std = jnp.exp(0.5 * qz_lv)                                      # EUP slot
    qz_mu_ref[...] = qz_mu
    qz_std_ref[...] = qz_std

    # ---- reparameterized sample (broadcast over K leading samples) ----
    eps = eps_ref[...]                                                 # [K*B, Lp]
    reps = eps.shape[0] // qz_mu.shape[0]                              # == K (static)
    if reps == 1:
        mu_rep, std_rep = qz_mu, qz_std
    else:
        mu_rep = jnp.tile(qz_mu, (reps, 1))
        std_rep = jnp.tile(qz_std, (reps, 1))
    zs = mu_rep + std_rep * eps                                        # [K*B, Lp]
    zs_ref[...] = zs

    # ---- decoder ----
    zb = zs.astype(mxu_dt)
    hd = jnp.dot(zb, dw1_ref[...], preferred_element_type=jnp.float32)
    hd = jnp.maximum(hd + db1_ref[...], 0.0)                           # [K*B, Hp]
    hdb = hd.astype(mxu_dt)
    px_mu_ref[...] = (jnp.dot(hdb, dw2m_ref[...],
                              preferred_element_type=jnp.float32)
                      + db2m_ref[...])                                 # [K*B, Dp]
    px_lv = (jnp.dot(hdb, dw2v_ref[...], preferred_element_type=jnp.float32)
             + db2v_ref[...])
    px_std_ref[...] = jnp.exp(0.5 * px_lv)


def vae_forward_fused(x_flat, eps_flat, params):
    """x_flat: [B, Dp] f32; eps_flat: [K*B, Lp] f32 (zero-padded lanes).

    Returns padded (qz_mu [B,Lp], qz_std [B,Lp], zs [K*B,Lp],
                    px_mu [K*B,Dp], px_std [K*B,Dp]).
    """
    B = x_flat.shape[0]
    KB, Lp = eps_flat.shape
    Dp = params[8].shape[1]   # dec_w2_mu: [Hp, Dp]

    inputs = (x_flat, eps_flat) + tuple(params)
    out_shape = (
        jax.ShapeDtypeStruct((B, Lp), jnp.float32),    # qz_mu
        jax.ShapeDtypeStruct((B, Lp), jnp.float32),    # qz_std
        jax.ShapeDtypeStruct((KB, Lp), jnp.float32),   # zs
        jax.ShapeDtypeStruct((KB, Dp), jnp.float32),   # px_mu
        jax.ShapeDtypeStruct((KB, Dp), jnp.float32),   # px_std
    )
    return pl.pallas_call(
        _vae_fused_kernel,
        grid=(1,),
        in_specs=[_full_spec(a.shape) for a in inputs],
        out_specs=tuple(_full_spec(s.shape) for s in out_shape),
        out_shape=out_shape,
        compiler_params=pltpu.CompilerParams(
            dimension_semantics=("arbitrary",)),
    )(*inputs)


# ----------------------------------------------------------------------------
# VAE (parameters + forward), mirroring the PyTorch module's forward()
# ----------------------------------------------------------------------------

class PallasVAE:
    def __init__(self, data_shape, hidden=32, latent=8, seed=0,
                 mxu_dtype=jnp.bfloat16):
        self.data_shape = tuple(data_shape)             # (C, H, W)
        self.data_dim = 1
        for d in data_shape:
            self.data_dim *= d
        self.hidden = hidden
        self.latent = latent

        D, H, L = self.data_dim, hidden, latent
        Dp = _round_up(D, _LANE)
        Hp = _round_up(H, _LANE)
        Lp = _round_up(L, _LANE)
        self.Dp, self.Hp, self.Lp = Dp, Hp, Lp

        key = jax.random.PRNGKey(seed)
        ks = jax.random.split(key, 4)

        def init(k, shape, fan_in):
            return (jax.random.normal(k, shape, jnp.float32)
                    / jnp.sqrt(jnp.float32(fan_in)))

        # encoder: D -> H -> (L mu | L logvar);  decoder: L -> H -> (D | D)
        enc_w1 = init(ks[0], (D, H), D)
        enc_w2 = init(ks[1], (H, 2 * L), H)
        dec_w1 = init(ks[2], (L, H), L)
        dec_w2 = init(ks[3], (H, 2 * D), H)

        wdt = mxu_dtype
        # Two-head layers split host-side; all hidden/latent (and data_dim)
        # lanes zero-padded to multiples of 128 -> lane-dense kernel stores.
        self.enc_w1 = _pad2d(enc_w1, Dp, Hp).astype(wdt)
        self.enc_b1 = jnp.zeros((1, Hp), jnp.float32)
        self.enc_w2_mu = _pad2d(enc_w2[:, :L], Hp, Lp).astype(wdt)
        self.enc_b2_mu = jnp.zeros((1, Lp), jnp.float32)
        self.enc_w2_lv = _pad2d(enc_w2[:, L:], Hp, Lp).astype(wdt)
        self.enc_b2_lv = jnp.zeros((1, Lp), jnp.float32)

        self.dec_w1 = _pad2d(dec_w1, Lp, Hp).astype(wdt)
        self.dec_b1 = jnp.zeros((1, Hp), jnp.float32)
        self.dec_w2_mu = _pad2d(dec_w2[:, :D], Hp, Dp).astype(wdt)
        self.dec_b2_mu = jnp.zeros((1, Dp), jnp.float32)
        self.dec_w2_lv = _pad2d(dec_w2[:, D:], Hp, Dp).astype(wdt)
        self.dec_b2_lv = jnp.zeros((1, Dp), jnp.float32)

        self._qz_x_params = None

    @property
    def qz_x_params(self):
        if self._qz_x_params is None:
            raise NameError('qz_x params not initalised yet!')
        return self._qz_x_params

    def _params(self):
        return (self.enc_w1, self.enc_b1,
                self.enc_w2_mu, self.enc_b2_mu, self.enc_w2_lv, self.enc_b2_lv,
                self.dec_w1, self.dec_b1,
                self.dec_w2_mu, self.dec_b2_mu, self.dec_w2_lv, self.dec_b2_lv)

    def forward(self, x, K=1, rng=None):
        """Returns (qz_x, px_z, zs) with Normal distributions represented by
        their (loc, scale) parameter tuples."""
        if rng is None:
            rng = jax.random.PRNGKey(42)
        B = x.shape[0]
        D, L = self.data_dim, self.latent
        Dp, Lp = self.Dp, self.Lp

        # Flatten (torch .view semantics, row-major NCHW) and pad lanes.
        x_flat = x.reshape(B, D)
        if Dp != D:
            x_flat = jnp.pad(x_flat, ((0, 0), (0, Dp - D)))

        # eps ~ N(0,1) of shape [K, B, L], exactly as qz_x.rsample([K]);
        # zero-pad the latent lanes and flatten to [K*B, Lp] for the kernel.
        eps = jax.random.normal(rng, (K, B, L), jnp.float32)
        eps_p = jnp.zeros((K, B, Lp), jnp.float32).at[:, :, :L].set(eps)
        eps_flat = eps_p.reshape(K * B, Lp)

        qz_mu_p, qz_std_p, zs_p, px_mu_p, px_std_p = vae_forward_fused(
            x_flat, eps_flat, self._params())

        qz_mu = qz_mu_p[:, :L]
        qz_std = qz_std_p[:, :L]
        zs = zs_p.reshape(K, B, Lp)[:, :, :L]
        px_mu = px_mu_p[:, :D].reshape(K, B, *self.data_shape)
        px_std = px_std_p[:, :D].reshape(K, B, *self.data_shape)

        # NOTE: instance-state capture of traced values; keep forward eager
        # (do not wrap in jax.jit) to mirror the PyTorch module's behavior.
        self._qz_x_params = (qz_mu, qz_std)
        qz_x = (qz_mu, qz_std)
        px_z = (px_mu, px_std)
        return qz_x, px_z, zs


# ----------------------------------------------------------------------------
# Driver
# ----------------------------------------------------------------------------

if __name__ == "__main__":
    B, C, H, W = 2, 4, 16, 16
    key = jax.random.PRNGKey(0)
    x = jax.random.normal(key, (B, C, H, W), jnp.float32)   # NCHW like PyTorch

    vae = PallasVAE(data_shape=(C, H, W), hidden=32, latent=8, seed=0)
    (qz_mu, qz_std), (px_mu, px_std), zs = vae.forward(x, K=1)

    jax.block_until_ready((qz_mu, qz_std, px_mu, px_std, zs))

    assert qz_mu.shape == (B, 8) and qz_std.shape == (B, 8)
    assert zs.shape == (1, B, 8)
    assert px_mu.shape == (1, B, C, H, W) and px_std.shape == (1, B, C, H, W)
    assert bool(jnp.all(qz_std > 0)) and bool(jnp.all(px_std > 0))
    assert bool(jnp.all(jnp.isfinite(px_mu))) and bool(jnp.all(jnp.isfinite(zs)))

    print("KERNEL_OK")
</pallas_src>

<mosaic_0001>
module attributes {stable_mosaic.version = 11 : i64} {
  func.func @_vae_fused_kernel(%arg0: i32, %arg1: memref<2x1024xf32, #tpu.memory_space<vmem>>, %arg2: memref<2x128xf32, #tpu.memory_space<vmem>>, %arg3: memref<1024x128xbf16, #tpu.memory_space<vmem>>, %arg4: memref<1x128xf32, #tpu.memory_space<vmem>>, %arg5: memref<128x128xbf16, #tpu.memory_space<vmem>>, %arg6: memref<1x128xf32, #tpu.memory_space<vmem>>, %arg7: memref<128x128xbf16, #tpu.memory_space<vmem>>, %arg8: memref<1x128xf32, #tpu.memory_space<vmem>>, %arg9: memref<128x128xbf16, #tpu.memory_space<vmem>>, %arg10: memref<1x128xf32, #tpu.memory_space<vmem>>, %arg11: memref<128x1024xbf16, #tpu.memory_space<vmem>>, %arg12: memref<1x1024xf32, #tpu.memory_space<vmem>>, %arg13: memref<128x1024xbf16, #tpu.memory_space<vmem>>, %arg14: memref<1x1024xf32, #tpu.memory_space<vmem>>, %arg15: memref<2x128xf32, #tpu.memory_space<vmem>>, %arg16: memref<2x128xf32, #tpu.memory_space<vmem>>, %arg17: memref<2x128xf32, #tpu.memory_space<vmem>>, %arg18: memref<2x1024xf32, #tpu.memory_space<vmem>>, %arg19: memref<2x1024xf32, #tpu.memory_space<vmem>>) attributes {dimension_semantics = [#tpu.dimension_semantics<arbitrary>], iteration_bounds = array<i64: 1>, scalar_prefetch = 0 : i64, scratch_operands = 0 : i64, tpu.core_type = #tpu.core_type<tc>, window_params = [{pipeline_mode = #tpu.pipeline_mode<synchronous>, transform_indices = @transform_0, window_bounds = array<i64: 2, 1024>}, {pipeline_mode = #tpu.pipeline_mode<synchronous>, transform_indices = @transform_1, window_bounds = array<i64: 2, 128>}, {pipeline_mode = #tpu.pipeline_mode<synchronous>, transform_indices = @transform_2, window_bounds = array<i64: 1024, 128>}, {pipeline_mode = #tpu.pipeline_mode<synchronous>, transform_indices = @transform_3, window_bounds = array<i64: 1, 128>}, {pipeline_mode = #tpu.pipeline_mode<synchronous>, transform_indices = @transform_4, window_bounds = array<i64: 128, 128>}, {pipeline_mode = #tpu.pipeline_mode<synchronous>, transform_indices = @transform_5, window_bounds = array<i64: 1, 128>}, {pipeline_mode = #tpu.pipeline_mode<synchronous>, transform_indices = @transform_6, window_bounds = array<i64: 128, 128>}, {pipeline_mode = #tpu.pipeline_mode<synchronous>, transform_indices = @transform_7, window_bounds = array<i64: 1, 128>}, {pipeline_mode = #tpu.pipeline_mode<synchronous>, transform_indices = @transform_8, window_bounds = array<i64: 128, 128>}, {pipeline_mode = #tpu.pipeline_mode<synchronous>, transform_indices = @transform_9, window_bounds = array<i64: 1, 128>}, {pipeline_mode = #tpu.pipeline_mode<synchronous>, transform_indices = @transform_10, window_bounds = array<i64: 128, 1024>}, {pipeline_mode = #tpu.pipeline_mode<synchronous>, transform_indices = @transform_11, window_bounds = array<i64: 1, 1024>}, {pipeline_mode = #tpu.pipeline_mode<synchronous>, transform_indices = @transform_12, window_bounds = array<i64: 128, 1024>}, {pipeline_mode = #tpu.pipeline_mode<synchronous>, transform_indices = @transform_13, window_bounds = array<i64: 1, 1024>}, {pipeline_mode = #tpu.pipeline_mode<synchronous>, transform_indices = @transform_14, window_bounds = array<i64: 2, 128>}, {pipeline_mode = #tpu.pipeline_mode<synchronous>, transform_indices = @transform_15, window_bounds = array<i64: 2, 128>}, {pipeline_mode = #tpu.pipeline_mode<synchronous>, transform_indices = @transform_16, window_bounds = array<i64: 2, 128>}, {pipeline_mode = #tpu.pipeline_mode<synchronous>, transform_indices = @transform_17, window_bounds = array<i64: 2, 1024>}, {pipeline_mode = #tpu.pipeline_mode<synchronous>, transform_indices = @transform_18, window_bounds = array<i64: 2, 1024>}]} {
    %c0 = arith.constant 0 : index
    %c0_0 = arith.constant 0 : index
    %0 = vector.load %arg1[%c0, %c0_0] : memref<2x1024xf32, #tpu.memory_space<vmem>>, vector<2x1024xf32>
    %1 = arith.truncf %0 : vector<2x1024xf32> to vector<2x1024xbf16>
    %c0_1 = arith.constant 0 : index
    %c0_2 = arith.constant 0 : index
    %2 = vector.load %arg3[%c0_1, %c0_2] : memref<1024x128xbf16, #tpu.memory_space<vmem>>, vector<1024x128xbf16>
    %cst = arith.constant dense<0.000000e+00> : vector<2x128xf32>
    %3 = tpu.matmul %1, %2, %cst {dimension_numbers = #tpu.dot_dimension_numbers<[1], [0], [0], [1], [0, 0, 1, 1], [], []>} : vector<2x1024xbf16>, vector<1024x128xbf16>, vector<2x128xf32> -> vector<2x128xf32>
    %c0_3 = arith.constant 0 : index
    %c0_4 = arith.constant 0 : index
    %4 = vector.load %arg4[%c0_3, %c0_4] : memref<1x128xf32, #tpu.memory_space<vmem>>, vector<1x128xf32>
    %5 = vector.broadcast %4 : vector<1x128xf32> to vector<2x128xf32>
    %6 = arith.addf %3, %5 : vector<2x128xf32>
    %cst_5 = arith.constant 0.000000e+00 : f32
    %7 = vector.broadcast %cst_5 : f32 to vector<2x128xf32>
    %8 = arith.maximumf %6, %7 : vector<2x128xf32>
    %9 = arith.truncf %8 : vector<2x128xf32> to vector<2x128xbf16>
    %c0_6 = arith.constant 0 : index
    %c0_7 = arith.constant 0 : index
    %10 = vector.load %arg5[%c0_6, %c0_7] : memref<128x128xbf16, #tpu.memory_space<vmem>>, vector<128x128xbf16>
    %cst_8 = arith.constant dense<0.000000e+00> : vector<2x128xf32>
    %11 = tpu.matmul %9, %10, %cst_8 {dimension_numbers = #tpu.dot_dimension_numbers<[1], [0], [0], [1], [0, 0, 1, 1], [], []>} : vector<2x128xbf16>, vector<128x128xbf16>, vector<2x128xf32> -> vector<2x128xf32>
    %c0_9 = arith.constant 0 : index
    %c0_10 = arith.constant 0 : index
    %12 = vector.load %arg6[%c0_9, %c0_10] : memref<1x128xf32, #tpu.memory_space<vmem>>, vector<1x128xf32>
    %13 = vector.broadcast %12 : vector<1x128xf32> to vector<2x128xf32>
    %14 = arith.addf %11, %13 : vector<2x128xf32>
    %c0_11 = arith.constant 0 : index
    %c0_12 = arith.constant 0 : index
    %15 = vector.load %arg7[%c0_11, %c0_12] : memref<128x128xbf16, #tpu.memory_space<vmem>>, vector<128x128xbf16>
    %cst_13 = arith.constant dense<0.000000e+00> : vector<2x128xf32>
    %16 = tpu.matmul %9, %15, %cst_13 {dimension_numbers = #tpu.dot_dimension_numbers<[1], [0], [0], [1], [0, 0, 1, 1], [], []>} : vector<2x128xbf16>, vector<128x128xbf16>, vector<2x128xf32> -> vector<2x128xf32>
    %c0_14 = arith.constant 0 : index
    %c0_15 = arith.constant 0 : index
    %17 = vector.load %arg8[%c0_14, %c0_15] : memref<1x128xf32, #tpu.memory_space<vmem>>, vector<1x128xf32>
    %18 = vector.broadcast %17 : vector<1x128xf32> to vector<2x128xf32>
    %19 = arith.addf %16, %18 : vector<2x128xf32>
    %cst_16 = arith.constant 5.000000e-01 : f32
    %20 = vector.broadcast %cst_16 : f32 to vector<2x128xf32>
    %21 = arith.mulf %20, %19 : vector<2x128xf32>
    %22 = math.exp %21 : vector<2x128xf32>
    %c0_17 = arith.constant 0 : index
    %c0_18 = arith.constant 0 : index
    %23 = vector.load %arg15[%c0_17, %c0_18] : memref<2x128xf32, #tpu.memory_space<vmem>>, vector<2x128xf32>
    tpu.vector_store %arg15[%c0_17, %c0_18], %14 {strides = array<i32>} : memref<2x128xf32, #tpu.memory_space<vmem>>, vector<2x128xf32>,
    %c0_19 = arith.constant 0 : index
    %c0_20 = arith.constant 0 : index
    %24 = vector.load %arg16[%c0_19, %c0_20] : memref<2x128xf32, #tpu.memory_space<vmem>>, vector<2x128xf32>
    tpu.vector_store %arg16[%c0_19, %c0_20], %22 {strides = array<i32>} : memref<2x128xf32, #tpu.memory_space<vmem>>, vector<2x128xf32>,
    %c0_21 = arith.constant 0 : index
    %c0_22 = arith.constant 0 : index
    %25 = vector.load %arg2[%c0_21, %c0_22] : memref<2x128xf32, #tpu.memory_space<vmem>>, vector<2x128xf32>
    %26 = arith.mulf %22, %25 : vector<2x128xf32>
    %27 = arith.addf %14, %26 : vector<2x128xf32>
    %c0_23 = arith.constant 0 : index
    %c0_24 = arith.constant 0 : index
    %28 = vector.load %arg17[%c0_23, %c0_24] : memref<2x128xf32, #tpu.memory_space<vmem>>, vector<2x128xf32>
    tpu.vector_store %arg17[%c0_23, %c0_24], %27 {strides = array<i32>} : memref<2x128xf32, #tpu.memory_space<vmem>>, vector<2x128xf32>,
    %29 = arith.truncf %27 : vector<2x128xf32> to vector<2x128xbf16>
    %c0_25 = arith.constant 0 : index
    %c0_26 = arith.constant 0 : index
    %30 = vector.load %arg9[%c0_25, %c0_26] : memref<128x128xbf16, #tpu.memory_space<vmem>>, vector<128x128xbf16>
    %cst_27 = arith.constant dense<0.000000e+00> : vector<2x128xf32>
    %31 = tpu.matmul %29, %30, %cst_27 {dimension_numbers = #tpu.dot_dimension_numbers<[1], [0], [0], [1], [0, 0, 1, 1], [], []>} : vector<2x128xbf16>, vector<128x128xbf16>, vector<2x128xf32> -> vector<2x128xf32>
    %c0_28 = arith.constant 0 : index
    %c0_29 = arith.constant 0 : index
    %32 = vector.load %arg10[%c0_28, %c0_29] : memref<1x128xf32, #tpu.memory_space<vmem>>, vector<1x128xf32>
    %33 = vector.broadcast %32 : vector<1x128xf32> to vector<2x128xf32>
    %34 = arith.addf %31, %33 : vector<2x128xf32>
    %cst_30 = arith.constant 0.000000e+00 : f32
    %35 = vector.broadcast %cst_30 : f32 to vector<2x128xf32>
    %36 = arith.maximumf %34, %35 : vector<2x128xf32>
    %37 = arith.truncf %36 : vector<2x128xf32> to vector<2x128xbf16>
    %c0_31 = arith.constant 0 : index
    %c0_32 = arith.constant 0 : index
    %38 = vector.load %arg11[%c0_31, %c0_32] : memref<128x1024xbf16, #tpu.memory_space<vmem>>, vector<128x1024xbf16>
    %cst_33 = arith.constant dense<0.000000e+00> : vector<2x1024xf32>
    %39 = tpu.matmul %37, %38, %cst_33 {dimension_numbers = #tpu.dot_dimension_numbers<[1], [0], [0], [1], [0, 0, 1, 1], [], []>} : vector<2x128xbf16>, vector<128x1024xbf16>, vector<2x1024xf32> -> vector<2x1024xf32>
    %c0_34 = arith.constant 0 : index
    %c0_35 = arith.constant 0 : index
    %40 = vector.load %arg12[%c0_34, %c0_35] : memref<1x1024xf32, #tpu.memory_space<vmem>>, vector<1x1024xf32>
    %41 = vector.broadcast %40 : vector<1x1024xf32> to vector<2x1024xf32>
    %42 = arith.addf %39, %41 : vector<2x1024xf32>
    %c0_36 = arith.constant 0 : index
    %c0_37 = arith.constant 0 : index
    %43 = vector.load %arg18[%c0_36, %c0_37] : memref<2x1024xf32, #tpu.memory_space<vmem>>, vector<2x1024xf32>
    tpu.vector_store %arg18[%c0_36, %c0_37], %42 {strides = array<i32>} : memref<2x1024xf32, #tpu.memory_space<vmem>>, vector<2x1024xf32>,
    %c0_38 = arith.constant 0 : index
    %c0_39 = arith.constant 0 : index
    %44 = vector.load %arg13[%c0_38, %c0_39] : memref<128x1024xbf16, #tpu.memory_space<vmem>>, vector<128x1024xbf16>
    %cst_40 = arith.constant dense<0.000000e+00> : vector<2x1024xf32>
    %45 = tpu.matmul %37, %44, %cst_40 {dimension_numbers = #tpu.dot_dimension_numbers<[1], [0], [0], [1], [0, 0, 1, 1], [], []>} : vector<2x128xbf16>, vector<128x1024xbf16>, vector<2x1024xf32> -> vector<2x1024xf32>
    %c0_41 = arith.constant 0 : index
    %c0_42 = arith.constant 0 : index
    %46 = vector.load %arg14[%c0_41, %c0_42] : memref<1x1024xf32, #tpu.memory_space<vmem>>, vector<1x1024xf32>
    %47 = vector.broadcast %46 : vector<1x1024xf32> to vector<2x1024xf32>
    %48 = arith.addf %45, %47 : vector<2x1024xf32>
    %cst_43 = arith.constant 5.000000e-01 : f32
    %49 = vector.broadcast %cst_43 : f32 to vector<2x1024xf32>
    %50 = arith.mulf %49, %48 : vector<2x1024xf32>
    %51 = math.exp %50 : vector<2x1024xf32>
    %c0_44 = arith.constant 0 : index
    %c0_45 = arith.constant 0 : index
    %52 = vector.load %arg19[%c0_44, %c0_45] : memref<2x1024xf32, #tpu.memory_space<vmem>>, vector<2x1024xf32>
    tpu.vector_store %arg19[%c0_44, %c0_45], %51 {strides = array<i32>} : memref<2x1024xf32, #tpu.memory_space<vmem>>, vector<2x1024xf32>,
    return
  }
  func.func @transform_0(%arg0: i32) -> (i32, i32) {
    %c0_i32 = arith.constant 0 : i32
    %c0_i32_0 = arith.constant 0 : i32
    %c0_i32_1 = arith.constant 0 : i32
    return %c0_i32, %c0_i32_0 : i32, i32
  }
  func.func @transform_1(%arg0: i32) -> (i32, i32) {
    %c0_i32 = arith.constant 0 : i32
    %c0_i32_0 = arith.constant 0 : i32
    %c0_i32_1 = arith.constant 0 : i32
    return %c0_i32, %c0_i32_0 : i32, i32
  }
  func.func @transform_2(%arg0: i32) -> (i32, i32) {
    %c0_i32 = arith.constant 0 : i32
    %c0_i32_0 = arith.constant 0 : i32
    %c0_i32_1 = arith.constant 0 : i32
    return %c0_i32, %c0_i32_0 : i32, i32
  }
  func.func @transform_3(%arg0: i32) -> (i32, i32) {
    %c0_i32 = arith.constant 0 : i32
    %c0_i32_0 = arith.constant 0 : i32
    %c0_i32_1 = arith.constant 0 : i32
    return %c0_i32, %c0_i32_0 : i32, i32
  }
  func.func @transform_4(%arg0: i32) -> (i32, i32) {
    %c0_i32 = arith.constant 0 : i32
    %c0_i32_0 = arith.constant 0 : i32
    %c0_i32_1 = arith.constant 0 : i32
    return %c0_i32, %c0_i32_0 : i32, i32
  }
  func.func @transform_5(%arg0: i32) -> (i32, i32) {
    %c0_i32 = arith.constant 0 : i32
    %c0_i32_0 = arith.constant 0 : i32
    %c0_i32_1 = arith.constant 0 : i32
    return %c0_i32, %c0_i32_0 : i32, i32
  }
  func.func @transform_6(%arg0: i32) -> (i32, i32) {
    %c0_i32 = arith.constant 0 : i32
    %c0_i32_0 = arith.constant 0 : i32
    %c0_i32_1 = arith.constant 0 : i32
    return %c0_i32, %c0_i32_0 : i32, i32
  }
  func.func @transform_7(%arg0: i32) -> (i32, i32) {
    %c0_i32 = arith.constant 0 : i32
    %c0_i32_0 = arith.constant 0 : i32
    %c0_i32_1 = arith.constant 0 : i32
    return %c0_i32, %c0_i32_0 : i32, i32
  }
  func.func @transform_8(%arg0: i32) -> (i32, i32) {
    %c0_i32 = arith.constant 0 : i32
    %c0_i32_0 = arith.constant 0 : i32
    %c0_i32_1 = arith.constant 0 : i32
    return %c0_i32, %c0_i32_0 : i32, i32
  }
  func.func @transform_9(%arg0: i32) -> (i32, i32) {
    %c0_i32 = arith.constant 0 : i32
    %c0_i32_0 = arith.constant 0 : i32
    %c0_i32_1 = arith.constant 0 : i32
    return %c0_i32, %c0_i32_0 : i32, i32
  }
  func.func @transform_10(%arg0: i32) -> (i32, i32) {
    %c0_i32 = arith.constant 0 : i32
    %c0_i32_0 = arith.constant 0 : i32
    %c0_i32_1 = arith.constant 0 : i32
    return %c0_i32, %c0_i32_0 : i32, i32
  }
  func.func @transform_11(%arg0: i32) -> (i32, i32) {
    %c0_i32 = arith.constant 0 : i32
    %c0_i32_0 = arith.constant 0 : i32
    %c0_i32_1 = arith.constant 0 : i32
    return %c0_i32, %c0_i32_0 : i32, i32
  }
  func.func @transform_12(%arg0: i32) -> (i32, i32) {
    %c0_i32 = arith.constant 0 : i32
    %c0_i32_0 = arith.constant 0 : i32
    %c0_i32_1 = arith.constant 0 : i32
    return %c0_i32, %c0_i32_0 : i32, i32
  }
  func.func @transform_13(%arg0: i32) -> (i32, i32) {
    %c0_i32 = arith.constant 0 : i32
    %c0_i32_0 = arith.constant 0 : i32
    %c0_i32_1 = arith.constant 0 : i32
    return %c0_i32, %c0_i32_0 : i32, i32
  }
  func.func @transform_14(%arg0: i32) -> (i32, i32) {
    %c0_i32 = arith.constant 0 : i32
    %c0_i32_0 = arith.constant 0 : i32
    %c0_i32_1 = arith.constant 0 : i32
    return %c0_i32, %c0_i32_0 : i32, i32
  }
  func.func @transform_15(%arg0: i32) -> (i32, i32) {
    %c0_i32 = arith.constant 0 : i32
    %c0_i32_0 = arith.constant 0 : i32
    %c0_i32_1 = arith.constant 0 : i32
    return %c0_i32, %c0_i32_0 : i32, i32
  }
  func.func @transform_16(%arg0: i32) -> (i32, i32) {
    %c0_i32 = arith.constant 0 : i32
    %c0_i32_0 = arith.constant 0 : i32
    %c0_i32_1 = arith.constant 0 : i32
    return %c0_i32, %c0_i32_0 : i32, i32
  }
  func.func @transform_17(%arg0: i32) -> (i32, i32) {
    %c0_i32 = arith.constant 0 : i32
    %c0_i32_0 = arith.constant 0 : i32
    %c0_i32_1 = arith.constant 0 : i32
    return %c0_i32, %c0_i32_0 : i32, i32
  }
  func.func @transform_18(%arg0: i32) -> (i32, i32) {
    %c0_i32 = arith.constant 0 : i32
    %c0_i32_0 = arith.constant 0 : i32
    %c0_i32_1 = arith.constant 0 : i32
    return %c0_i32, %c0_i32_0 : i32, i32
  }
}

</mosaic_0001>

<bundles_post_ra>
// kernel: tpu_custom_call.1
= control target key start
LH: loop header
LB: loop body
LE: loop exit
PB: predicated region body
PF: predicated region fallthrough
CT: control target
= control target key end

     0   :  { %s4053_s0 = inlined_call_operand.hbm [shape: f32[2,1024], index: 0, kind: input, shape index: {}]   ;;  %s4054_s1 = inlined_call_operand.hbm [shape: f32[2,128], index: 1, kind: input, shape index: {}]   ;;  %s4055_s2 = inlined_call_operand.hbm [shape: bf16[1024,128], index: 2, kind: input, shape index: {}]   ;;  %s4056_s3 = inlined_call_operand.vmem [shape: f32[1,128], index: 3, kind: input, shape index: {}]   ;;  %s4057_s4 = inlined_call_operand.hbm [shape: bf16[128,128], index: 4, kind: input, shape index: {}]   ;;  %s4058_s5 = inlined_call_operand.vmem [shape: f32[1,128], index: 5, kind: input, shape index: {}]   ;;  %s4059_s6 = inlined_call_operand.hbm [shape: bf16[128,128], index: 6, kind: input, shape index: {}]   ;;  %s4060_s7 = inlined_call_operand.hbm [shape: f32[1,128], index: 7, kind: input, shape index: {}]   ;;  %s4061_s8 = inlined_call_operand.hbm [shape: bf16[128,128], index: 8, kind: input, shape index: {}]   ;;  %s4062_s9 = inlined_call_operand.hbm [shape: f32[1,128], index: 9, kind: input, shape index: {}]   ;;  %s4063_s10 = inlined_call_operand.hbm [shape: bf16[128,1024], index: 10, kind: input, shape index: {}]   ;;  %s4064_s11 = inlined_call_operand.vmem [shape: f32[1,1024], index: 11, kind: input, shape index: {}]   ;;  %s4065_s12 = inlined_call_operand.hbm [shape: bf16[128,1024], index: 12, kind: input, shape index: {}]   ;;  %s4066_s13 = inlined_call_operand.hbm [shape: f32[1,1024], index: 13, kind: input, shape index: {}]   ;;  %s4067_s14 = inlined_call_operand.hbm [shape: f32[2,128], index: 14, kind: output, shape index: {0}]   ;;  %s4068_s15 = inlined_call_operand.hbm [shape: f32[2,128], index: 15, kind: output, shape index: {1}]   ;;  %s4069_s16 = inlined_call_operand.hbm [shape: f32[2,128], index: 16, kind: output, shape index: {2}]   ;;  %s4070_s17 = inlined_call_operand.hbm [shape: f32[2,1024], index: 17, kind: output, shape index: {3}]   ;;  %s4071_s18 = inlined_call_operand.hbm [shape: f32[2,1024], index: 18, kind: output, shape index: {4}]  }
   0x1   :  { %4072 = sst [smem:[#allocation36_spill]] %s4053_s0 }
   0x2   :  { %4073 = sst [smem:[#allocation37_spill]] %s4054_s1 }
   0x3   :  { %4074 = sst [smem:[#allocation38_spill]] %s4055_s2 }
   0x4   :  { %24 = vsyncpa [#allocation3], 0 }
   0x5   :  { %25 = vsyncpa [#allocation6], 0 }
   0x6   :  { %26 = vsyncpa [#allocation9], 0 }
   0x7   :  { %27 = vsyncpa [#allocation12], 0 }
   0x8   :  { %28 = vsyncpa [#allocation15], 0 }
   0x9   :  { %29 = vsyncpa [#allocation18], 0 }
   0xa   :  { %30 = vsyncpa [#allocation4], 0 }
   0xb   :  { %31 = vsyncpa [#allocation22], 0  ;;  %s4075_s29 = sld [smem:[#allocation37_spill]] }
  0x11   :  { %s49_s30 = sshll.u32 %s4075_s29, 4  ;;  %s50_s30 = int_to_ptr.hbm [resolvable:$true] %s49_s30 }
  0x12   :  { %32 = vsyncpa [#allocation25], 0  ;;  %s3819_s0 = smov [#allocation5]   ;;  %s74_s21 = sshll.u32 %s4057_s4, 4  ;;  %s75_s21 = int_to_ptr.hbm [resolvable:$true] %s74_s21 }
  0x13   :  { %s51_s19 = sshll.u32 %s3819_s0, 4  ;;  %s3820_s22 = smov [#allocation8]   ;;  %s52_s19 = int_to_ptr.vmem [resolvable:$true] %s51_s19 }
  0x14   :  { %54 = dma.hbm_to_vmem [thread:$0]  %s50_s30, 32, %s52_s19, [#allocation6]  }
  0x15   :  { %s76_s2 = sshll.u32 %s3820_s22, 4  ;;  %s103_s25 = sshll.u32 %s4060_s7, 4  ;;  %s77_s2 = int_to_ptr.vmem [resolvable:$true] %s76_s2  ;;  %s104_s25 = int_to_ptr.hbm [resolvable:$true] %s103_s25 }
  0x16   :  { %s3821_s26 = smov 64   ;;  %s3822_s27 = smov 4  }
  0x17   :  { %82 = dma.hbm_to_vmem [thread:$0]  %s75_s21, 1024, %s77_s2, [#allocation9], %s3821_s26, %s3821_s26, %s3822_s27  }
  0x18   :  { %s127_s30 = sshll.u32 %s4062_s9, 4  ;;  %s3823_s4 = smov [#allocation11]   ;;  %s128_s30 = int_to_ptr.hbm [resolvable:$true] %s127_s30 }
  0x19   :  { %s105_s0 = sshll.u32 %s3823_s4, 4  ;;  %s3824_s19 = smov [#allocation14]   ;;  %s106_s0 = int_to_ptr.vmem [resolvable:$true] %s105_s0 }
  0x1a   :  { %108 = dma.hbm_to_vmem [thread:$0]  %s104_s25, 16, %s106_s0, [#allocation12]  }
  0x1b   :  { %s129_s1 = sshll.u32 %s3824_s19, 4  ;;  %s152_s22 = sshll.u32 %s4065_s12, 4  ;;  %s130_s1 = int_to_ptr.vmem [resolvable:$true] %s129_s1  ;;  %s153_s22 = int_to_ptr.hbm [resolvable:$true] %s152_s22 }
  0x1c   :  { %132 = dma.hbm_to_vmem [thread:$0]  %s128_s30, 16, %s130_s1, [#allocation15]  }
  0x1d   :  { %s3825_s23 = smov [#allocation17]   ;;  %s4076_s9 = sld [smem:[#allocation36_spill]] }
  0x1e   :  { %s154_s21 = sshll.u32 %s3825_s23, 4  ;;  %s3826_s29 = smov 512   ;;  %s155_s21 = int_to_ptr.vmem [resolvable:$true] %s154_s21 }
  0x1f   :  { %s3827_s4 = smov 32   ;;  %s3828_s25 = smov [#allocation2]  }
  0x20   :  { %160 = dma.hbm_to_vmem [thread:$0]  %s153_s22, 8192, %s155_s21, [#allocation18], %s3826_s29, %s3826_s29, %s3827_s4  }
  0x21   :  { %s40_s30 = sshll.u32 %s3828_s25, 4  ;;  %s4077_s12 = sld [smem:[#allocation38_spill]]  ;;  %s41_s30 = int_to_ptr.vmem [resolvable:$true] %s40_s30 }
  0x22   :  { %s89_s23 = sshll.u32 %s4059_s6, 4  ;;  %s3829_s2 = smov [#allocation7]   ;;  %s90_s23 = int_to_ptr.hbm [resolvable:$true] %s89_s23 }
  0x23   :  { %s38_s28 = sshll.u32 %s4076_s9, 4  ;;  %s61_s24 = sshll.u32 %s3829_s2, 4  ;;  %s39_s28 = int_to_ptr.hbm [resolvable:$true] %s38_s28  ;;  %s62_s24 = int_to_ptr.vmem [resolvable:$true] %s61_s24 }
  0x24   :  { %43 = dma.hbm_to_vmem [thread:$0]  %s39_s28, 256, %s41_s30, [#allocation3]  }
  0x25   :  { %s3830_s22 = smov [#allocation10]   ;;  %s113_s0 = sshll.u32 %s4061_s8, 4  ;;  %s114_s0 = int_to_ptr.hbm [resolvable:$true] %s113_s0 }
  0x26   :  { %s91_s21 = sshll.u32 %s3830_s22, 4  ;;  %s137_s30 = sshll.u32 %s4063_s10, 4  ;;  %s92_s21 = int_to_ptr.vmem [resolvable:$true] %s91_s21  ;;  %s138_s30 = int_to_ptr.hbm [resolvable:$true] %s137_s30 }
  0x27   :  { %s59_s1 = sshll.u32 %s4077_s12, 4  ;;  %s3831_s19 = smov [#allocation13]   ;;  %s60_s1 = int_to_ptr.hbm [resolvable:$true] %s59_s1 }
  0x28   :  { %67 = dma.hbm_to_vmem [thread:$0]  %s60_s1, 8192, %s62_s24, [#allocation6], %s3821_s26, %s3821_s26, %s3822_s27  }
  0x29   :  { %97 = dma.hbm_to_vmem [thread:$0]  %s90_s23, 1024, %s92_s21, [#allocation9], %s3821_s26, %s3821_s26, %s3822_s27  }
  0x2a   :  { %s115_s12 = sshll.u32 %s3831_s19, 4  ;;  %s3832_s1 = smov [#allocation16]   ;;  %s116_s12 = int_to_ptr.vmem [resolvable:$true] %s115_s12 }
  0x2b   :  { %121 = dma.hbm_to_vmem [thread:$0]  %s114_s0, 1024, %s116_s12, [#allocation12], %s3821_s26, %s3821_s26, %s3822_s27  }
  0x2c   :  { %s139_s8 = sshll.u32 %s3832_s1, 4  ;;  %s166_s2 = sshll.u32 %s4066_s13, 4  ;;  %s140_s8 = int_to_ptr.vmem [resolvable:$true] %s139_s8  ;;  %s167_s2 = int_to_ptr.hbm [resolvable:$true] %s166_s2 }
  0x2d   :  { %145 = dma.hbm_to_vmem [thread:$0]  %s138_s30, 8192, %s140_s8, [#allocation15], %s3826_s29, %s3826_s29, %s3827_s4  }
  0x2e   :  { %s3833_s10 = smov [#allocation19]  }
  0x2f   :  { %s168_s23 = sshll.u32 %s3833_s10, 4  ;;  %s169_s23 = int_to_ptr.vmem [resolvable:$true] %s168_s23 }
  0x30   :  { %171 = dma.hbm_to_vmem [thread:$0]  %s167_s2, 128, %s169_s23, [#allocation18]  }
  0x31   :  { %3801 = dma.done.wait [#allocation3], 256  }
  0x32   :  { %3802 = vsyncadd [#allocation3], 4294967040 }
  0x33   :  { %3803 = dma.done.wait [#allocation6], 8224  }
  0x34   :  { %3804 = vsyncadd [#allocation6], 4294959072 }
  0x35   :  { %3805 = dma.done.wait [#allocation9], 2048  }
  0x36   :  { %3806 = vsyncadd [#allocation9], 4294965248 }
  0x37   :  { %3807 = dma.done.wait [#allocation12], 1040  }
  0x38   :  { %3808 = vsyncadd [#allocation12], 4294966256 }
  0x39   :  { %3809 = dma.done.wait [#allocation15], 8208  }
  0x3a   :  { %3810 = vsyncadd [#allocation15], 4294959088 }
  0x3b   :  { %3811 = dma.done.wait [#allocation18], 8320  }
  0x3c   :  { %3812 = vsyncadd [#allocation18], 4294958976  ;;  %v3166_v0 = vld [vmem:[#allocation7 + $0x38] sm:$0xff]  ;;  %v3165_v4 = vld [vmem:[#allocation7 + $0x30] sm:$0xff]  ;;  %s2229_s22 = sshll.u32 %s4068_s15, 4  ;;  %s2218_s25 = sshll.u32 %s4067_s14, 4  ;;  %s2230_s22 = int_to_ptr.hbm [resolvable:$true] %s2229_s22  ;;  %s2219_s25 = int_to_ptr.hbm [resolvable:$true] %s2218_s25 }
  0x3d   :  { %v3174_v1 = vld [vmem:[#allocation7 + $0x78] sm:$0xff]  ;;  %763 = vmatpush.bf16.msra.mxu0 %v3166_v0  ;;  %v3173_v5 = vld [vmem:[#allocation7 + $0x70] sm:$0xff]  ;;  %v3164_v8 = vld [vmem:[#allocation7 + $0x28] sm:$0xff]  ;;  %s3835_s0 = smov [#allocation20]   ;;  %s3836_s28 = smov [#allocation23]   ;;  %vm1644_vm0 = vcmask 1041408  }
  0x3e   :  { %v3182_v2 = vld [vmem:[#allocation7 + $0xb8] sm:$0xff]  ;;  %776 = vmatpush.bf16.msra.mxu1 %v3174_v1  ;;  %v3181_v6 = vld [vmem:[#allocation7 + $0xb0] sm:$0xff]  ;;  %v3172_v9 = vld [vmem:[#allocation7 + $0x68] sm:$0xff]  ;;  %s2216_s6 = sshll.u32 %s3835_s0, 4  ;;  %s2238_s30 = sshll.u32 %s3836_s28, 4  ;;  %vm1646_vm1 = vcmask 1045508   ;;  %s2217_s6 = int_to_ptr.vmem [resolvable:$true] %s2216_s6  ;;  %s2239_s30 = int_to_ptr.vmem [resolvable:$true] %s2238_s30 }
  0x3f   :  { %v3190_v3 = vld [vmem:[#allocation7 + $0xf8] sm:$0xff]  ;;  %789 = vmatpush.bf16.msra.mxu2 %v3182_v2  ;;  %v3189_v7 = vld [vmem:[#allocation7 + $0xf0] sm:$0xff]  ;;  %v3180_v10 = vld [vmem:[#allocation7 + $0xa8] sm:$0xff]  ;;  %s2240_s1 = sshll.u32 %s4069_s16, 4  ;;  %vm1648_vm2 = vcmask 1043456   ;;  %s2251_s20 = sshll.u32 %s4070_s17, 4  ;;  %s2241_s1 = int_to_ptr.hbm [resolvable:$true] %s2240_s1  ;;  %s2252_s20 = int_to_ptr.hbm [resolvable:$true] %s2251_s20 }
  0x40   :  { %802 = vmatpush.bf16.msra.mxu3 %v3190_v3  ;;  %v3188_v11 = vld [vmem:[#allocation7 + $0xe8] sm:$0xff]  ;;  %v3163_v12 = vld [vmem:[#allocation7 + $0x20] sm:$0xff]  ;;  %v3162_v17 = vld [vmem:[#allocation7 + $0x18] sm:$0xff]  ;;  %s3838_s17 = smov [#allocation26]   ;;  %s2262_s13 = sshll.u32 %s4071_s18, 4  ;;  %s2263_s13 = int_to_ptr.hbm [resolvable:$true] %s2262_s13 }
  0x41   :  { %764 = vmatpush.bf16.msra.mxu0 %v3165_v4  ;;  %v3171_v13 = vld [vmem:[#allocation7 + $0x60] sm:$0xff]  ;;  %v216_v16 = vld [vmem:[#allocation2] sm:$0xff]  ;;  %v3170_v18 = vld [vmem:[#allocation7 + $0x58] sm:$0xff]  ;;  %s2260_s2 = sshll.u32 %s3838_s17, 4  ;;  %s2261_s2 = int_to_ptr.vmem [resolvable:$true] %s2260_s2 }
  0x42   :  { %777 = vmatpush.bf16.msra.mxu1 %v3173_v5  ;;  %v3179_v14 = vld [vmem:[#allocation7 + $0xa0] sm:$0xff]  ;;  %220 = vst [vmem:[#allocation1] ss:$4 sm:$0xff] %v216_v16  ;;  %v3178_v19 = vld [vmem:[#allocation7 + $0x98] sm:$0xff]  ;;  %v3161_v21 = vld [vmem:[#allocation7 + $0x10] sm:$0xff] }
  0x43   :  { %790 = vmatpush.bf16.msra.mxu2 %v3181_v6  ;;  %v3187_v15 = vld [vmem:[#allocation7 + $0xe0] sm:$0xff]  ;;  %v3186_v20 = vld [vmem:[#allocation7 + $0xd8] sm:$0xff]  ;;  %v3169_v22 = vld [vmem:[#allocation7 + $0x50] sm:$0xff] }
  0x44   :  { %803 = vmatpush.bf16.msra.mxu3 %v3189_v7  ;;  %v3177_v23 = vld [vmem:[#allocation7 + $0x90] sm:$0xff]  ;;  %v3160_v25 = vld [vmem:[#allocation7 + $0x8] sm:$0xff]  ;;  %v3159_v30 = vld [vmem:[#allocation7] sm:$0xff] }
  0x45   :  { %765 = vmatpush.bf16.msra.mxu0 %v3164_v8  ;;  %v3185_v24 = vld [vmem:[#allocation7 + $0xd0] sm:$0xff]  ;;  %v3168_v26 = vld [vmem:[#allocation7 + $0x48] sm:$0xff]  ;;  %v3167_v31 = vld [vmem:[#allocation7 + $0x40] sm:$0xff] }
  0x46   :  { %778 = vmatpush.bf16.msra.mxu1 %v3172_v9  ;;  %v3176_v27 = vld [vmem:[#allocation7 + $0x88] sm:$0xff]  ;;  %v217_v29 = vld [vmem:[#allocation2 + $0x8] sm:$0xff]  ;;  %v3175_v32 = vld [vmem:[#allocation7 + $0x80] sm:$0xff] }
  0x47   :  { %791 = vmatpush.bf16.msra.mxu2 %v3180_v10  ;;  %v3184_v28 = vld [vmem:[#allocation7 + $0xc8] sm:$0xff]  ;;  %222 = vst [vmem:[#allocation1 + $0x20] ss:$4 sm:$0xff] %v217_v29  ;;  %v3183_v33 = vld [vmem:[#allocation7 + $0xc0] sm:$0xff]  ;;  %v3198_v34 = vld [vmem:[#allocation7 + $0x138] sm:$0xff] }
  0x48   :  { %804 = vmatpush.bf16.msra.mxu3 %v3188_v11  ;;  %v3206_v35 = vld [vmem:[#allocation7 + $0x178] sm:$0xff]  ;;  %v3197_v46 = vld [vmem:[#allocation7 + $0x130] sm:$0xff]  ;;  %v3196_v50 = vld [vmem:[#allocation7 + $0x128] sm:$0xff] }
  0x49   :  { %766 = vmatpush.bf16.msra.mxu0 %v3163_v12  ;;  %v225_v36 = vld.sshfl [vmem:[#allocation1 + $0x10] sm:$0xff pattern:$0x73625140]  ;;  %v223_v37 = vld.sshfl [vmem:[#allocation1] sm:$0xff pattern:$0x73625140] }
  0x4a   :  { %779 = vmatpush.bf16.msra.mxu1 %v3171_v13  ;;  %v226_v38 = vld.sshfl [vmem:[#allocation1 + $0x18] sm:$0xff pattern:$0x73625140]  ;;  %v224_v39 = vld.sshfl [vmem:[#allocation1 + $0x8] sm:$0xff pattern:$0x73625140]  ;;  %v241_v42 = vpack.c.bf16 %v225_v36, %v225_v36  ;;  %v239_v43 = vpack.c.bf16 %v223_v37, %v223_v37 }
  0x4b   :  { %792 = vmatpush.bf16.msra.mxu2 %v3179_v14  ;;  %v3214_v40 = vld [vmem:[#allocation7 + $0x1b8] sm:$0xff]  ;;  %v242_v44 = vpack.c.bf16 %v226_v38, %v226_v38  ;;  %v240_v45 = vpack.c.bf16 %v224_v39, %v224_v39  ;;  %v3205_v47 = vld [vmem:[#allocation7 + $0x170] sm:$0xff]  ;;  %v3204_v51 = vld [vmem:[#allocation7 + $0x168] sm:$0xff] }
  0x4c   :  { %805 = vmatpush.bf16.msra.mxu3 %v3187_v15  ;;  %v3222_v41 = vld [vmem:[#allocation7 + $0x1f8] sm:$0xff]  ;;  %v3213_v48 = vld [vmem:[#allocation7 + $0x1b0] sm:$0xff]  ;;  %v3212_v52 = vld [vmem:[#allocation7 + $0x1a8] sm:$0xff] }
  0x4d   :  { %767 = vmatpush.bf16.msra.mxu0 %v3162_v17  ;;  %v3221_v49 = vld [vmem:[#allocation7 + $0x1f0] sm:$0xff]  ;;  %v3220_v53 = vld [vmem:[#allocation7 + $0x1e8] sm:$0xff]  ;;  %v3195_v54 = vld [vmem:[#allocation7 + $0x120] sm:$0xff] }
  0x4e   :  { %780 = vmatpush.bf16.msra.mxu1 %v3170_v18  ;;  %v3203_v55 = vld [vmem:[#allocation7 + $0x160] sm:$0xff]  ;;  %v3194_v58 = vld [vmem:[#allocation7 + $0x118] sm:$0xff]  ;;  %v3193_v62 = vld [vmem:[#allocation7 + $0x110] sm:$0xff] }
  0x4f   :  { %793 = vmatpush.bf16.msra.mxu2 %v3178_v19  ;;  %v3211_v56 = vld [vmem:[#allocation7 + $0x1a0] sm:$0xff]  ;;  %v3202_v59 = vld [vmem:[#allocation7 + $0x158] sm:$0xff]  ;;  %v3201_v63 = vld [vmem:[#allocation7 + $0x150] sm:$0xff] }
  0x50   :  { %806 = vmatpush.bf16.msra.mxu3 %v3186_v20  ;;  %v3219_v57 = vld [vmem:[#allocation7 + $0x1e0] sm:$0xff]  ;;  %v3210_v60 = vld [vmem:[#allocation7 + $0x198] sm:$0xff]  ;;  %v3209_v0 = vld [vmem:[#allocation7 + $0x190] sm:$0xff] }
  0x51   :  { %768 = vmatpush.bf16.msra.mxu0 %v3161_v21  ;;  %v3218_v61 = vld [vmem:[#allocation7 + $0x1d8] sm:$0xff]  ;;  %v3217_v1 = vld [vmem:[#allocation7 + $0x1d0] sm:$0xff]  ;;  %v3192_v2 = vld [vmem:[#allocation7 + $0x108] sm:$0xff] }
  0x52   :  { %781 = vmatpush.bf16.msra.mxu1 %v3169_v22  ;;  %v3200_v3 = vld [vmem:[#allocation7 + $0x148] sm:$0xff]  ;;  %v3191_v6 = vld [vmem:[#allocation7 + $0x100] sm:$0xff]  ;;  %v229_v12 = vld.sshfl [vmem:[#allocation1 + $0x30] sm:$0xff pattern:$0x73625140] }
  0x53   :  { %794 = vmatpush.bf16.msra.mxu2 %v3177_v23  ;;  %v3208_v4 = vld [vmem:[#allocation7 + $0x188] sm:$0xff]  ;;  %v3199_v7 = vld [vmem:[#allocation7 + $0x140] sm:$0xff]  ;;  %v245_v16 = vpack.c.bf16 %v229_v12, %v229_v12  ;;  %v3230_v18 = vld [vmem:[#allocation8 + $0x38] sm:$0xff] }
  0x54   :  { %807 = vmatpush.bf16.msra.mxu3 %v3185_v24  ;;  %v3216_v5 = vld [vmem:[#allocation7 + $0x1c8] sm:$0xff]  ;;  %v3207_v8 = vld [vmem:[#allocation7 + $0x180] sm:$0xff]  ;;  %v3238_v19 = vld [vmem:[#allocation10 + $0x38] sm:$0xff] }
  0x55   :  { %769 = vmatpush.bf16.msra.mxu0 %v3160_v25  ;;  %v3215_v9 = vld [vmem:[#allocation7 + $0x1c0] sm:$0xff]  ;;  %v228_v11 = vld.sshfl [vmem:[#allocation1 + $0x28] sm:$0xff pattern:$0x73625140] }
  0x56   :  { %782 = vmatpush.bf16.msra.mxu1 %v3168_v26  ;;  %v227_v10 = vld.sshfl [vmem:[#allocation1 + $0x20] sm:$0xff pattern:$0x73625140]  ;;  %v230_v13 = vld.sshfl [vmem:[#allocation1 + $0x38] sm:$0xff pattern:$0x73625140]  ;;  %v244_v15 = vpack.c.bf16 %v228_v11, %v228_v11 }
  0x57   :  { %795 = vmatpush.bf16.msra.mxu2 %v3176_v27  ;;  %v243_v14 = vpack.c.bf16 %v227_v10, %v227_v10  ;;  %v246_v17 = vpack.c.bf16 %v230_v13, %v230_v13  ;;  %v3229_v20 = vld [vmem:[#allocation8 + $0x30] sm:$0xff]  ;;  %v3228_v22 = vld [vmem:[#allocation8 + $0x28] sm:$0xff]  ;;  %v3227_v24 = vld [vmem:[#allocation8 + $0x20] sm:$0xff] }
  0x58   :  { %808 = vmatpush.bf16.msra.mxu3 %v3184_v28  ;;  %v3237_v21 = vld [vmem:[#allocation10 + $0x30] sm:$0xff]  ;;  %v3236_v23 = vld [vmem:[#allocation10 + $0x28] sm:$0xff]  ;;  %v3235_v25 = vld [vmem:[#allocation10 + $0x20] sm:$0xff] }
  0x59   :  { %770 = vmatpush.bf16.msra.mxu0 %v3159_v30  ;;  %v3226_v26 = vld [vmem:[#allocation8 + $0x18] sm:$0xff]  ;;  %v3225_v29 = vld [vmem:[#allocation8 + $0x10] sm:$0xff]  ;;  %v3223_v37 = vld [vmem:[#allocation8] sm:$0xff] }
  0x5a   :  { %783 = vmatpush.bf16.msra.mxu1 %v3167_v31  ;;  %v3234_v27 = vld [vmem:[#allocation10 + $0x18] sm:$0xff]  ;;  %v3233_v30 = vld [vmem:[#allocation10 + $0x10] sm:$0xff]  ;;  %v3231_v38 = vld [vmem:[#allocation10] sm:$0xff] }
  0x5b   :  { %796 = vmatpush.bf16.msra.mxu2 %v3175_v32  ;;  %v3224_v32 = vld [vmem:[#allocation8 + $0x8] sm:$0xff] }
  0x5c   :  { %809 = vmatpush.bf16.msra.mxu3 %v3183_v33  ;;  %771 = vmatmul.bf16.vlgmr.msra.gmra.mxu0 %v239_v43  ;;  %v3232_v33 = vld [vmem:[#allocation10 + $0x8] sm:$0xff] }
  0x5d   :  { %815 = vmatpush.bf16.msrb.mxu0 %v3198_v34  ;;  %784 = vmatmul.bf16.vlgmr.msra.gmra.mxu1 %v240_v45  ;;  %v2881_v10 = vld [vmem:[#allocation16 + $0x1c8] sm:$0xf] }
  0x5e   :  { %828 = vmatpush.bf16.msrb.mxu1 %v3206_v35  ;;  %797 = vmatmul.bf16.vlgmr.msra.gmra.mxu2 %v241_v42  ;;  %v3308_v11 = vld [vmem:[#allocation16 + $0x1e4] sm:$0xf0] }
  0x5f   :  { %841 = vmatpush.bf16.msrb.mxu2 %v3214_v40  ;;  %810 = vmatmul.bf16.vlgmr.msra.gmra.mxu3 %v242_v44  ;;  %v3395_v40 = vld [vmem:[%s4056_s3] ss:$0 sm:$0xff]  ;;  %v3245_v44 = vld [vmem:[#allocation13 + $0x30] sm:$0xff]  ;;  %v2882_v13 = vor.u32 %v3308_v11, %v2881_v10  ;;  %v2715_v10 = vld [vmem:[#allocation16 + $0xa0] sm:$0xf0] }
  0x60   :  { %854 = vmatpush.bf16.msrb.mxu3 %v3222_v41  ;;  %v3246_v41 = vld [vmem:[#allocation13 + $0x38] sm:$0xff] }
  0x61   :  { %816 = vmatpush.bf16.msrb.mxu0 %v3197_v46  ;;  %v3244_v46 = vld [vmem:[#allocation13 + $0x28] sm:$0xff] }
  0x62   :  { %829 = vmatpush.bf16.msrb.mxu1 %v3205_v47 }
  0x63   :  { %842 = vmatpush.bf16.msrb.mxu2 %v3213_v48 }
  0x64   :  { %855 = vmatpush.bf16.msrb.mxu3 %v3221_v49 }
  0x65   :  { %817 = vmatpush.bf16.msrb.mxu0 %v3196_v50 }
  0x66   :  { %830 = vmatpush.bf16.msrb.mxu1 %v3204_v51 }
  0x67   :  { %843 = vmatpush.bf16.msrb.mxu2 %v3212_v52 }
  0x68   :  { %856 = vmatpush.bf16.msrb.mxu3 %v3220_v53 }
  0x69   :  { %818 = vmatpush.bf16.msrb.mxu0 %v3195_v54 }
  0x6a   :  { %831 = vmatpush.bf16.msrb.mxu1 %v3203_v55 }
  0x6b   :  { %844 = vmatpush.bf16.msrb.mxu2 %v3211_v56 }
  0x6c   :  { %857 = vmatpush.bf16.msrb.mxu3 %v3219_v57 }
  0x6d   :  { %819 = vmatpush.bf16.msrb.mxu0 %v3194_v58 }
  0x6e   :  { %832 = vmatpush.bf16.msrb.mxu1 %v3202_v59 }
  0x6f   :  { %845 = vmatpush.bf16.msrb.mxu2 %v3210_v60 }
  0x70   :  { %858 = vmatpush.bf16.msrb.mxu3 %v3218_v61 }
  0x71   :  { %820 = vmatpush.bf16.msrb.mxu0 %v3193_v62 }
  0x72   :  { %833 = vmatpush.bf16.msrb.mxu1 %v3201_v63 }
  0x73   :  { %846 = vmatpush.bf16.msrb.mxu2 %v3209_v0  ;;  %v3243_v0 = vld [vmem:[#allocation13 + $0x20] sm:$0xff] }
  0x74   :  { %859 = vmatpush.bf16.msrb.mxu3 %v3217_v1  ;;  %v3242_v1 = vld [vmem:[#allocation13 + $0x18] sm:$0xff] }
  0x75   :  { %821 = vmatpush.bf16.msrb.mxu0 %v3192_v2  ;;  %v3241_v2 = vld [vmem:[#allocation13 + $0x10] sm:$0xff] }
  0x76   :  { %834 = vmatpush.bf16.msrb.mxu1 %v3200_v3  ;;  %v3240_v3 = vld [vmem:[#allocation13 + $0x8] sm:$0xff] }
  0x77   :  { %847 = vmatpush.bf16.msrb.mxu2 %v3208_v4  ;;  %v3239_v4 = vld [vmem:[#allocation13] sm:$0xff] }
  0x78   :  { %860 = vmatpush.bf16.msrb.mxu3 %v3216_v5  ;;  %v2873_v5 = vld [vmem:[#allocation16 + $0x1c0] sm:$0xf] }
  0x79   :  { %822 = vmatpush.bf16.msrb.mxu0 %v3191_v6  ;;  %v3307_v6 = vld [vmem:[#allocation16 + $0x1dc] sm:$0xf0] }
  0x7a   :  { %835 = vmatpush.bf16.msrb.mxu1 %v3199_v7  ;;  %v3303_v7 = vld [vmem:[#allocation16 + $0x1c4] sm:$0xf] }
  0x7b   :  { %848 = vmatpush.bf16.msrb.mxu2 %v3207_v8  ;;  %v2874_v8 = vor.u32 %v3307_v6, %v2873_v5  ;;  %v2713_v5 = vld [vmem:[#allocation16 + $0x80] sm:$0xf] }
  0x7c   :  { %861 = vmatpush.bf16.msrb.mxu3 %v3215_v9  ;;  %823 = vmatmul.bf16.vlgmr.msrb.gmra.mxu0 %v243_v14  ;;  %v2875_v9 = vld [vmem:[#allocation16 + $0x1e0] sm:$0xf0]  ;;  %v3304_v14 = vld [vmem:[#allocation16 + $0x1cc] sm:$0xf] }
  0x7d   :  { %836 = vmatmul.bf16.vlgmr.msrb.gmra.mxu1 %v244_v15  ;;  %937 = vmatpush.bf16.msra.mxu0 %v3230_v18  ;;  %v2878_v12 = vor.u32 %v3303_v7, %v2875_v9  ;;  %v2883_v15 = vld [vmem:[#allocation16 + $0x1e8] sm:$0xf0]  ;;  %v3299_v18 = vld [vmem:[#allocation16 + $0x19c] sm:$0xf0]  ;;  %v3263_v9 = vld [vmem:[#allocation16 + $0x84] sm:$0xf] }
  0x7e   :  { %849 = vmatmul.bf16.vlgmr.msrb.gmra.mxu2 %v245_v16  ;;  %1018 = vmatpush.bf16.msra.mxu1 %v3238_v19  ;;  %v2841_v16 = vld [vmem:[#allocation16 + $0x180] sm:$0xf]  ;;  %v3295_v19 = vld [vmem:[#allocation16 + $0x184] sm:$0xf] }
  0x7f   :  { %862 = vmatmul.bf16.vlgmr.msrb.gmra.mxu3 %v246_v17  ;;  %1109 = vmatpush.bf16.msra.mxu2 %v3246_v41  ;;  %v2886_v17 = vor.u32 %v3304_v14, %v2883_v15  ;;  %v3268_v14 = vld [vmem:[#allocation16 + $0xa4] sm:$0xf0]  ;;  %v3264_v15 = vld [vmem:[#allocation16 + $0x8c] sm:$0xf] }
  0x80   :  { %1526 = vmatpush.bf16.msra.mxu3 %v2874_v8  ;;  %v3267_v8 = vld [vmem:[#allocation16 + $0x9c] sm:$0xf0] }
  0x81   :  { %938 = vmatpush.bf16.msra.mxu0 %v3229_v20  ;;  %v2843_v20 = vld [vmem:[#allocation16 + $0x1a0] sm:$0xf0] }
  0x82   :  { %1019 = vmatpush.bf16.msra.mxu1 %v3237_v21  ;;  %v2842_v21 = vor.u32 %v3299_v18, %v2841_v16  ;;  %v2723_v16 = vld [vmem:[#allocation16 + $0xa8] sm:$0xf0] }
  0x83   :  { %1110 = vmatpush.bf16.msra.mxu2 %v3245_v44  ;;  %v3279_v44 = vld [vmem:[#allocation16 + $0x104] sm:$0xf] }
  0x84   :  { %1527 = vmatpush.bf16.msra.mxu3 %v2842_v21 }
  0x85   :  { %939 = vmatpush.bf16.msra.mxu0 %v3228_v22  ;;  %v2846_v22 = vor.u32 %v3295_v19, %v2843_v20  ;;  %v2718_v20 = vor.u32 %v3263_v9, %v2715_v10  ;;  %v2825_v10 = vld [vmem:[#allocation16 + $0x150] sm:$0xf] }
  0x86   :  { %1020 = vmatpush.bf16.msra.mxu1 %v3236_v23  ;;  %v2849_v23 = vld [vmem:[#allocation16 + $0x188] sm:$0xf] }
  0x87   :  { %1111 = vmatpush.bf16.msra.mxu2 %v3244_v46  ;;  %v2779_v46 = vld [vmem:[#allocation16 + $0x120] sm:$0xf0] }
  0x89   :  { %940 = vmatpush.bf16.msra.mxu0 %v3227_v24  ;;  %v3300_v24 = vld [vmem:[#allocation16 + $0x1a4] sm:$0xf0] }
  0x8a   :  { %1021 = vmatpush.bf16.msra.mxu1 %v3235_v25  ;;  %v3296_v25 = vld [vmem:[#allocation16 + $0x18c] sm:$0xf] }
  0x8b   :  { %1112 = vmatpush.bf16.msra.mxu2 %v3243_v0  ;;  %v3276_v0 = vld [vmem:[#allocation16 + $0xe4] sm:$0xf0] }
  0x8d   :  { %941 = vmatpush.bf16.msra.mxu0 %v3226_v26  ;;  %v2850_v26 = vor.u32 %v3300_v24, %v2849_v23  ;;  %v3259_v23 = vld [vmem:[#allocation16 + $0x5c] sm:$0xf0]  ;;  %v3255_v24 = vld [vmem:[#allocation16 + $0x44] sm:$0xf] }
  0x8e   :  { %1022 = vmatpush.bf16.msra.mxu1 %v3234_v27  ;;  %v2851_v27 = vld [vmem:[#allocation16 + $0x1a8] sm:$0xf0] }
  0x8f   :  { %1113 = vmatpush.bf16.msra.mxu2 %v3242_v1  ;;  %v3272_v1 = vld [vmem:[#allocation16 + $0xcc] sm:$0xf] }
  0x91   :  { %942 = vmatpush.bf16.msra.mxu0 %v3225_v29  ;;  %v3291_v29 = vld [vmem:[#allocation16 + $0x15c] sm:$0xf0] }
  0x92   :  { %1023 = vmatpush.bf16.msra.mxu1 %v3233_v30  ;;  %v2854_v30 = vor.u32 %v3296_v25, %v2851_v27  ;;  %v2726_v25 = vor.u32 %v3264_v15, %v2723_v16  ;;  %v2689_v27 = vld [vmem:[#allocation16 + $0x48] sm:$0xf]  ;;  %v2827_v15 = vld [vmem:[#allocation16 + $0x170] sm:$0xf0]  ;;  %v2833_v16 = vld [vmem:[#allocation16 + $0x158] sm:$0xf] }
  0x93   :  { %1114 = vmatpush.bf16.msra.mxu2 %v3241_v2  ;;  %v2755_v2 = vld [vmem:[#allocation16 + $0xe8] sm:$0xf0] }
  0x95   :  { %943 = vmatpush.bf16.msra.mxu0 %v3224_v32  ;;  %v2811_v32 = vld [vmem:[#allocation16 + $0x160] sm:$0xf0] }
  0x96   :  { %1024 = vmatpush.bf16.msra.mxu1 %v3232_v33  ;;  %v2817_v33 = vld [vmem:[#allocation16 + $0x148] sm:$0xf] }
  0x97   :  { %1115 = vmatpush.bf16.msra.mxu2 %v3240_v3 }
  0x99   :  { %944 = vmatpush.bf16.msra.mxu0 %v3223_v37  ;;  %v3292_v37 = vld [vmem:[#allocation16 + $0x164] sm:$0xf0] }
  0x9a   :  { %1025 = vmatpush.bf16.msra.mxu1 %v3231_v38  ;;  %v3288_v38 = vld [vmem:[#allocation16 + $0x14c] sm:$0xf]  ;;  %v2818_v41 = vor.u32 %v3292_v37, %v2817_v33  ;;  %v2649_v33 = vld [vmem:[#allocation16] sm:$0xf]  ;;  %v3247_v37 = vld [vmem:[#allocation16 + $0x4] sm:$0xf] }
  0x9b   :  { %1116 = vmatpush.bf16.msra.mxu2 %v3239_v4 }
  0x9d   :  { %1539 = vmatpush.bf16.msrb.mxu0 %v2878_v12  ;;  %v2758_v12 = vor.u32 %v3272_v1, %v2755_v2 }
  0x9e   :  { %1552 = vmatpush.bf16.msrb.mxu1 %v2882_v13  ;;  %v2721_v13 = vld [vmem:[#allocation16 + $0x88] sm:$0xf] }
  0x9f   :  { %1565 = vmatpush.bf16.msrb.mxu2 %v2886_v17  ;;  %v2714_v17 = vor.u32 %v3267_v8, %v2713_v5  ;;  %v2722_v21 = vor.u32 %v3268_v14, %v2721_v13  ;;  %v3302_v5 = vld [vmem:[#allocation16 + $0x1b4] sm:$0xf0]  ;;  %v3289_v14 = vld [vmem:[#allocation16 + $0x154] sm:$0xf] }
  0xa1   :  { %1540 = vmatpush.bf16.msrb.mxu0 %v2846_v22  ;;  %v2681_v22 = vld [vmem:[#allocation16 + $0x40] sm:$0xf] }
  0xa2   :  { %1553 = vmatpush.bf16.msrb.mxu1 %v2850_v26  ;;  %v2683_v26 = vld [vmem:[#allocation16 + $0x60] sm:$0xf0] }
  0xa3   :  { %1566 = vmatpush.bf16.msrb.mxu2 %v2854_v30  ;;  %v2691_v30 = vld [vmem:[#allocation16 + $0x68] sm:$0xf0] }
  0xa6   :  { %1554 = vmatpush.bf16.msrb.mxu1 %v2818_v41 }
  0xd9   :  { %v772_v28 = vpop.f32.mrf.mxu0 }
  0xda   :  { %v785_v31 = vpop.f32.mrf.mxu1  ;;  %v773_v45 = vadd.f32 %v3395_v40, %v772_v28  ;;  %v2809_v28 = vld [vmem:[#allocation16 + $0x140] sm:$0xf] }
  0xdc   :  { %v786_v47 = vadd.f32 %v785_v31, %v773_v45  ;;  %v3287_v31 = vld [vmem:[#allocation16 + $0x144] sm:$0xf] }
  0xdd   :  { %v2814_v40 = vor.u32 %v3287_v31, %v2811_v32  ;;  %v1036_v31 = vld [vmem:[#allocation5] sm:$0x3]  ;;  %v2682_v32 = vor.u32 %v3259_v23, %v2681_v22  ;;  %v2793_v22 = vld [vmem:[#allocation16 + $0x110] sm:$0xf] }
  0xde   :  { %v3285_v23 = vld [vmem:[#allocation16 + $0x12c] sm:$0xf0] }
  0xdf   :  { %1541 = vmatpush.bf16.msrb.mxu0 %v2814_v40 }
  0xe1   :  { %v798_v34 = vpop.f32.mrf.mxu2  ;;  %v774_v36 = vpop.f32.mrf.mxu0 }
  0xe2   :  { %v811_v35 = vpop.f32.mrf.mxu3  ;;  %v787_v39 = vpop.f32.mrf.mxu1  ;;  %v799_v48 = vadd.f32 %v798_v34, %v786_v47  ;;  %v3396_v34 = vld [vmem:[%s4058_s5] ss:$0 sm:$0xff]  ;;  %v2810_v36 = vor.u32 %v3291_v29, %v2809_v28  ;;  %v2785_v47 = vld [vmem:[#allocation16 + $0x108] sm:$0xf]  ;;  %v3256_v29 = vld [vmem:[#allocation16 + $0x4c] sm:$0xf] }
  0xe3   :  { %v2819_v39 = vld [vmem:[#allocation16 + $0x168] sm:$0xf0]  ;;  %v3260_v28 = vld [vmem:[#allocation16 + $0x64] sm:$0xf0]  ;;  %v2694_v41 = vor.u32 %v3256_v29, %v2691_v30  ;;  %v3286_v29 = vld [vmem:[#allocation16 + $0x134] sm:$0xf0] }
  0xe4   :  { %v812_v49 = vadd.f32 %v811_v35, %v799_v48  ;;  %v3397_v35 = vld [vmem:[#allocation11] ss:$0 sm:$0xff]  ;;  %v2822_v45 = vor.u32 %v3288_v38, %v2819_v39  ;;  %v3284_v48 = vld [vmem:[#allocation16 + $0x124] sm:$0xf0]  ;;  %1528 = vmatpush.bf16.msra.mxu3 %v2810_v36  ;;  %v2690_v36 = vor.u32 %v3260_v28, %v2689_v27  ;;  %v2651_v38 = vld [vmem:[#allocation16 + $0x20] sm:$0xf0] }
  0xe5   :  { %v2657_v39 = vld [vmem:[#allocation16 + $0x8] sm:$0xf]  ;;  %v2795_v27 = vld [vmem:[#allocation16 + $0x130] sm:$0xf0]  ;;  %v2801_v28 = vld [vmem:[#allocation16 + $0x118] sm:$0xf] }
  0xe6   :  { %1567 = vmatpush.bf16.msrb.mxu2 %v2822_v45  ;;  %v3282_v30 = vld [vmem:[#allocation16 + $0x11c] sm:$0xf]  ;;  %s3834_s5 = smov [#allocation21]  }
  0xe7   :  { %s2227_s29 = sshll.u32 %s3834_s5, 4  ;;  %s2228_s29 = int_to_ptr.vmem [resolvable:$true] %s2227_s29 }
  0xe9   :  { %v800_v42 = vpop.f32.mrf.mxu2 }
  0xea   :  { %v813_v43 = vpop.f32.mrf.mxu3  ;;  %v2777_v42 = vld [vmem:[#allocation16 + $0x100] sm:$0xf] }
  0xeb   :  { %v3283_v43 = vld [vmem:[#allocation16 + $0x11c] sm:$0xf0] }
  0xf9   :  { %v824_v50 = vpop.f32.mrf.mxu0 }
  0xfa   :  { %v837_v51 = vpop.f32.mrf.mxu1  ;;  %v825_v52 = vadd.f32 %v824_v50, %v812_v49  ;;  %v3280_v49 = vld [vmem:[#allocation16 + $0x10c] sm:$0xf] }
  0xfb   :  { %v2787_v50 = vld [vmem:[#allocation16 + $0x128] sm:$0xf0] }
  0xfc   :  { %v838_v53 = vadd.f32 %v837_v51, %v825_v52  ;;  %v2778_v51 = vor.u32 %v3283_v43, %v2777_v42  ;;  %v3252_v42 = vld [vmem:[#allocation16 + $0x24] sm:$0xf0]  ;;  %v3248_v43 = vld [vmem:[#allocation16 + $0xc] sm:$0xf] }
  0xfe   :  { %1529 = vmatpush.bf16.msra.mxu3 %v2778_v51  ;;  %v2897_v51 = vld [vmem:[#allocation16 + $0x1d8] sm:$0xf] }
 0x101   :  { %v850_v54 = vpop.f32.mrf.mxu2  ;;  %v826_v57 = vpop.f32.mrf.mxu0 }
 0x102   :  { %v863_v55 = vpop.f32.mrf.mxu3  ;;  %v851_v56 = vadd.f32 %v850_v54, %v838_v53  ;;  %v839_v58 = vpop.f32.mrf.mxu1  ;;  %v2782_v54 = vor.u32 %v3279_v44, %v2779_v46  ;;  %v3275_v57 = vld [vmem:[#allocation16 + $0xdc] sm:$0xf0]  ;;  %v2659_v44 = vld [vmem:[#allocation16 + $0x28] sm:$0xf0]  ;;  %v2889_v46 = vld [vmem:[#allocation16 + $0x1d0] sm:$0xf] }
 0x103   :  { %v3271_v58 = vld [vmem:[#allocation16 + $0xc4] sm:$0xf] }
 0x104   :  { %v864_v59 = vadd.f32 %v863_v55, %v851_v56  ;;  %v2786_v55 = vor.u32 %v3284_v48, %v2785_v47  ;;  %v2745_v56 = vld [vmem:[#allocation16 + $0xc0] sm:$0xf]  ;;  %1542 = vmatpush.bf16.msrb.mxu0 %v2782_v54  ;;  %v3309_v47 = vld [vmem:[#allocation16 + $0x1ec] sm:$0xf0]  ;;  %v3310_v54 = vld [vmem:[#allocation16 + $0x1f4] sm:$0xf0] }
 0x105   :  { %v2746_v4 = vor.u32 %v3275_v57, %v2745_v56  ;;  %v2899_v56 = vld [vmem:[#allocation16 + $0x1f8] sm:$0xf0]  ;;  %v2658_v57 = vor.u32 %v3252_v42, %v2657_v39  ;;  %v2898_v1 = vor.u32 %v3310_v54, %v2897_v51  ;;  %v2763_v39 = vld [vmem:[#allocation16 + $0xf0] sm:$0xf0] }
 0x106   :  { %v867_v60 = vmax.f32 %v864_v59, 0.0  ;;  %1555 = vmatpush.bf16.msrb.mxu1 %v2786_v55  ;;  %v3306_v55 = vld [vmem:[#allocation16 + $0x1dc] sm:$0xf]  ;;  %v2731_v51 = vld [vmem:[#allocation16 + $0xb0] sm:$0xf0] }
 0x107   :  { %1530 = vmatpush.bf16.msra.mxu3 %v2746_v4  ;;  %v2902_v2 = vor.u32 %v3306_v55, %v2899_v56  ;;  %v2865_v4 = vld [vmem:[#allocation16 + $0x198] sm:$0xf]  ;;  %v3274_v42 = vld [vmem:[#allocation16 + $0xdc] sm:$0xf] }
 0x108   :  { %v868_v61 = vpack.c.bf16 %v867_v60, %v867_v60  ;;  %v3266_v54 = vld [vmem:[#allocation16 + $0x9c] sm:$0xf] }
 0x109   :  { %v852_v62 = vpop.f32.mrf.mxu2  ;;  %v2739_v55 = vld [vmem:[#allocation16 + $0xb8] sm:$0xf0] }
 0x10a   :  { %v865_v63 = vpop.f32.mrf.mxu3  ;;  %945 = vmatmul.bf16.vlgmr.msra.gmra.mxu0 %v868_v61  ;;  %1026 = vmatmul.bf16.vlgmr.msra.gmra.mxu1 %v868_v61  ;;  %v2790_v61 = vor.u32 %v3280_v49, %v2787_v50  ;;  %v2747_v62 = vld [vmem:[#allocation16 + $0xe0] sm:$0xf0]  ;;  %v3305_v49 = vld [vmem:[#allocation16 + $0x1d4] sm:$0xf] }
 0x10b   :  { %v2753_v63 = vld [vmem:[#allocation16 + $0xc8] sm:$0xf]  ;;  %v2750_v6 = vor.u32 %v3271_v58, %v2747_v62  ;;  %1531 = vmatpush.bf16.msra.mxu3 %v2714_v17  ;;  %v2891_v50 = vld [vmem:[#allocation16 + $0x1f0] sm:$0xf0]  ;;  %v2662_v58 = vor.u32 %v3248_v43, %v2659_v44  ;;  %v3294_v17 = vld [vmem:[#allocation16 + $0x174] sm:$0xf0] }
 0x10c   :  { %v2754_v7 = vor.u32 %v3276_v0, %v2753_v63  ;;  %1568 = vmatpush.bf16.msrb.mxu2 %v2790_v61  ;;  %v2890_v61 = vor.u32 %v3309_v47, %v2889_v46  ;;  %v2894_v62 = vor.u32 %v3305_v49, %v2891_v50  ;;  %v2857_v63 = vld [vmem:[#allocation16 + $0x190] sm:$0xf]  ;;  %v2771_v43 = vld [vmem:[#allocation16 + $0xf8] sm:$0xf0]  ;;  %v3265_v50 = vld [vmem:[#allocation16 + $0x94] sm:$0xf] }
 0x10d   :  { %1543 = vmatpush.bf16.msrb.mxu0 %v2750_v6  ;;  %v3301_v0 = vld [vmem:[#allocation16 + $0x1ac] sm:$0xf0]  ;;  %v3298_v6 = vld [vmem:[#allocation16 + $0x19c] sm:$0xf]  ;;  %v2774_v49 = vor.u32 %v3274_v42, %v2771_v43  ;;  %v3364_v42 = vld [vmem:[#allocation17 + $0x1a4] sm:$0xf0] }
 0x10e   :  { %1556 = vmatpush.bf16.msrb.mxu1 %v2754_v7  ;;  %v2867_v7 = vld [vmem:[#allocation16 + $0x1b8] sm:$0xf0]  ;;  %v2858_v8 = vor.u32 %v3301_v0, %v2857_v63  ;;  %v2729_v46 = vld [vmem:[#allocation16 + $0x90] sm:$0xf]  ;;  %v3257_v63 = vld [vmem:[#allocation16 + $0x54] sm:$0xf] }
 0x10f   :  { %1532 = vmatpush.bf16.msra.mxu3 %v2682_v32  ;;  %v2870_v13 = vor.u32 %v3298_v6, %v2867_v7  ;;  %v2794_v32 = vor.u32 %v3285_v23, %v2793_v22  ;;  %v3269_v47 = vld [vmem:[#allocation16 + $0xac] sm:$0xf0]  ;;  %v2707_v6 = vld [vmem:[#allocation16 + $0x78] sm:$0xf0]  ;;  %v3129_v23 = vld [vmem:[#allocation17 + $0x1c0] sm:$0xf] }
 0x110   :  { %1569 = vmatpush.bf16.msrb.mxu2 %v2758_v12  ;;  %v2866_v12 = vor.u32 %v3302_v5, %v2865_v4  ;;  %v2730_v56 = vor.u32 %v3269_v47, %v2729_v46  ;;  %v3258_v5 = vld [vmem:[#allocation16 + $0x5c] sm:$0xf]  ;;  %v3360_v43 = vld [vmem:[#allocation17 + $0x18c] sm:$0xf] }
 0x111   :  { %1544 = vmatpush.bf16.msrb.mxu0 %v2718_v20  ;;  %v2710_v7 = vor.u32 %v3258_v5, %v2707_v6  ;;  %v3043_v5 = vld [vmem:[#allocation17 + $0x128] sm:$0xf0] }
 0x112   :  { %1557 = vmatpush.bf16.msrb.mxu1 %v2722_v21  ;;  %v2830_v21 = vor.u32 %v3289_v14, %v2827_v15  ;;  %v3254_v14 = vld [vmem:[#allocation16 + $0x34] sm:$0xf0] }
 0x114   :  { %1570 = vmatpush.bf16.msrb.mxu2 %v2726_v25 }
 0x116   :  { %1558 = vmatpush.bf16.msrb.mxu1 %v2690_v36  ;;  %v2802_v36 = vor.u32 %v3286_v29, %v2801_v28  ;;  %v3372_v28 = vld [vmem:[#allocation17 + $0x1e4] sm:$0xf0] }
 0x118   :  { %1571 = vmatpush.bf16.msrb.mxu2 %v2694_v41  ;;  %v3278_v41 = vld [vmem:[#allocation16 + $0xf4] sm:$0xf0] }
 0x11a   :  { %1559 = vmatpush.bf16.msrb.mxu1 %v2658_v57  ;;  %v2734_v57 = vor.u32 %v3265_v50, %v2731_v51 }
 0x11c   :  { %1572 = vmatpush.bf16.msrb.mxu2 %v2662_v58 }
 0x11e   :  { %1604 = vmatpush.bf16.msra.mxu1 %v2898_v1  ;;  %v2699_v1 = vld [vmem:[#allocation16 + $0x70] sm:$0xf0] }
 0x122   :  { %1605 = vmatpush.bf16.msra.mxu1 %v2866_v12  ;;  %v2667_v12 = vld [vmem:[#allocation16 + $0x30] sm:$0xf0] }
 0x187   :  { %v946_v52 = vpop.f32.mrf.mxu0  ;;  %v1027_v53 = vpop.f32.mrf.mxu1 }
 0x188   :  { %v3991_v59 = vadd.f32 %v3396_v34, %v946_v52  ;;  %v1028_v60 = vadd.f32 %v3397_v35, %v1027_v53  ;;  %v3251_v34 = vld [vmem:[#allocation16 + $0x1c] sm:$0xf0]  ;;  %v2686_v35 = vor.u32 %v3255_v24, %v2683_v26  ;;  %v2654_v53 = vor.u32 %v3247_v37, %v2651_v38  ;;  %v3281_v26 = vld [vmem:[#allocation16 + $0x114] sm:$0xf] }
 0x189   :  { %v2650_v48 = vor.u32 %v3251_v34, %v2649_v33  ;;  %v2834_v24 = vor.u32 %v3294_v17, %v2833_v16  ;;  %v2798_v33 = vor.u32 %v3281_v26, %v2795_v27  ;;  %v2761_v34 = vld [vmem:[#allocation16 + $0xd0] sm:$0xf]  ;;  %v3273_v38 = vld [vmem:[#allocation16 + $0xd4] sm:$0xf]  ;;  %v3250_v17 = vld [vmem:[#allocation16 + $0x1c] sm:$0xf] }
 0x18a   :  { %1034 = vst [vmem:[#allocation20] sm:$0x3] %v3991_v59  ;;  %v1031_v3 = vmul.f32 0.5, %v1028_v60  ;;  %1545 = vmatpush.bf16.msrb.mxu0 %v2686_v35  ;;  %v3277_v35 = vld [vmem:[#allocation16 + $0xec] sm:$0xf0] }
 0x18b   :  { %1533 = vmatpush.bf16.msra.mxu3 %v2650_v48  ;;  %1606 = vmatpush.bf16.msra.mxu1 %v2834_v24  ;;  %v2762_v44 = vor.u32 %v3277_v35, %v2761_v34  ;;  %v3371_v24 = vld [vmem:[#allocation17 + $0x1dc] sm:$0xf0]  ;;  %v3131_v26 = vld [vmem:[#allocation17 + $0x1e0] sm:$0xf0]  ;;  %v3137_v27 = vld [vmem:[#allocation17 + $0x1c8] sm:$0xf] }
 0x18c   :  { %v1032_v11 = vmul.f32 1.442695, %v1031_v3  ;;  %v3297_v3 = vld [vmem:[#allocation16 + $0x194] sm:$0xf]  ;;  %v3097_v35 = vld [vmem:[#allocation17 + $0x180] sm:$0xf] }
 0x18d   :  { %2221 = dma.vmem_to_hbm [thread:$0]  %s2217_s6, 32, %s2219_s25, [#allocation4]  }
 0x18e   :  { %3399 = vpow2.f32 %v1032_v11  ;;  %1546 = vmatpush.bf16.msrb.mxu0 %v2654_v53  ;;  %v3293_v11 = vld [vmem:[#allocation16 + $0x16c] sm:$0xf0]  ;;  %v3270_v53 = vld [vmem:[#allocation16 + $0xb4] sm:$0xf0] }
 0x18f   :  { %v948_v18 = vpop.f32.mrf.mxu0  ;;  %v1029_v19 = vpop.f32.mrf.mxu1  ;;  %1578 = vmatpush.bf16.msrb.mxu3 %v2890_v61  ;;  %v2826_v20 = vor.u32 %v3293_v11, %v2825_v10  ;;  %1607 = vmatpush.bf16.msra.mxu1 %v2802_v36  ;;  %v2697_v61 = vld [vmem:[#allocation16 + $0x50] sm:$0xf]  ;;  %v3249_v10 = vld [vmem:[#allocation16 + $0x14] sm:$0xf]  ;;  %v3363_v36 = vld [vmem:[#allocation17 + $0x19c] sm:$0xf0] }
 0x190   :  { %v3290_v18 = vld [vmem:[#allocation16 + $0x15c] sm:$0xf]  ;;  %v2670_v15 = vor.u32 %v3249_v10, %v2667_v12  ;;  %v3098_v46 = vor.u32 %v3363_v36, %v3097_v35  ;;  %v3335_v12 = vld [vmem:[#allocation17 + $0xc4] sm:$0xf] }
 0x191   :  { %v2835_v19 = vld [vmem:[#allocation16 + $0x178] sm:$0xf0] }
 0x192   :  { %1591 = vmatpush.bf16.msra.mxu0 %v2894_v62  ;;  %v2838_v25 = vor.u32 %v3290_v18, %v2835_v19  ;;  %v3261_v62 = vld [vmem:[#allocation16 + $0x6c] sm:$0xf0]  ;;  %v2675_v18 = vld [vmem:[#allocation16 + $0x38] sm:$0xf0] }
 0x193   :  { %1579 = vmatpush.bf16.msrb.mxu3 %v2858_v8  ;;  %v2698_v0 = vor.u32 %v3261_v62, %v2697_v61  ;;  %v2665_v8 = vld [vmem:[#allocation16 + $0x10] sm:$0xf]  ;;  %v2678_v19 = vor.u32 %v3250_v17, %v2675_v18  ;;  %v3033_v61 = vld [vmem:[#allocation17 + $0x100] sm:$0xf]  ;;  %v3011_v17 = vld [vmem:[#allocation17 + $0xe8] sm:$0xf0] }
 0x194   :  { %v3400_v40 = vpop.eup %3399  ;;  %v3347_v62 = vld [vmem:[#allocation17 + $0x11c] sm:$0xf0] }
 0x195   :  { %v1037_v45 = vmul.f32 %v3400_v40, %v1036_v31  ;;  %1035 = vst [vmem:[#allocation21] sm:$0x3] %v3400_v40  ;;  %v2803_v31 = vld [vmem:[#allocation16 + $0x138] sm:$0xf0]  ;;  %v2769_v40 = vld [vmem:[#allocation16 + $0xd8] sm:$0xf]  ;;  %v3034_v6 = vor.u32 %v3347_v62, %v3033_v61 }
 0x196   :  { %v2806_v37 = vor.u32 %v3282_v30, %v2803_v31  ;;  %v2770_v48 = vor.u32 %v3278_v41, %v2769_v40  ;;  %v3368_v30 = vld [vmem:[#allocation17 + $0x1cc] sm:$0xf]  ;;  %v3099_v40 = vld [vmem:[#allocation17 + $0x1a0] sm:$0xf0]  ;;  %v3105_v41 = vld [vmem:[#allocation17 + $0x188] sm:$0xf] }
 0x197   :  { %v1038_v52 = vadd.f32 %v1037_v45, %v3991_v59  ;;  %v2859_v59 = vld [vmem:[#allocation16 + $0x1b0] sm:$0xf0]  ;;  %1580 = vmatpush.bf16.msrb.mxu3 %v2826_v20  ;;  %v2766_v45 = vor.u32 %v3273_v38, %v2763_v39  ;;  %v3398_v20 = vld [vmem:[#allocation14] ss:$0 sm:$0xff]  ;;  %v3139_v31 = vld [vmem:[#allocation17 + $0x1e8] sm:$0xf0]  ;;  %v3106_v50 = vor.u32 %v3364_v42, %v3105_v41 }
 0x198   :  { %v2862_v9 = vor.u32 %v3297_v3, %v2859_v59  ;;  %1608 = vmatpush.bf16.msra.mxu1 %v2770_v48  ;;  %v3262_v3 = vld [vmem:[#allocation16 + $0x74] sm:$0xf0]  ;;  %v2702_v59 = vor.u32 %v3257_v63, %v2699_v1  ;;  %v3142_v38 = vor.u32 %v3368_v30, %v3139_v31  ;;  %v3359_v39 = vld [vmem:[#allocation17 + $0x184] sm:$0xf]  ;;  %v3065_v48 = vld [vmem:[#allocation17 + $0x140] sm:$0xf] }
 0x199   :  { %v1040_v60 = vpack.c.bf16 %v1038_v52, %v1038_v52  ;;  %1039 = vst [vmem:[#allocation23] sm:$0x3] %v1038_v52  ;;  %v2737_v52 = vld [vmem:[#allocation16 + $0x98] sm:$0xf]  ;;  %v3102_v47 = vor.u32 %v3359_v39, %v3099_v40  ;;  %v3343_v1 = vld [vmem:[#allocation17 + $0x104] sm:$0xf] }
 0x19a   :  { %1592 = vmatpush.bf16.msra.mxu0 %v2862_v9  ;;  %v2738_v58 = vor.u32 %v3270_v53, %v2737_v52  ;;  %v3253_v9 = vld [vmem:[#allocation16 + $0x2c] sm:$0xf0]  ;;  %v3351_v52 = vld [vmem:[#allocation17 + $0x144] sm:$0xf]  ;;  %v2945_v39 = vld [vmem:[#allocation17 + $0x48] sm:$0xf] }
 0x19b   :  { %1117 = vmatmul.bf16.vlgmr.msra.gmra.mxu2 %v1040_v60  ;;  %1581 = vmatpush.bf16.msrb.mxu3 %v2794_v32  ;;  %v2742_v60 = vor.u32 %v3266_v54, %v2739_v55  ;;  %v2666_v11 = vor.u32 %v3253_v9, %v2665_v8  ;;  %v3067_v53 = vld [vmem:[#allocation17 + $0x160] sm:$0xf0]  ;;  %v3073_v54 = vld [vmem:[#allocation17 + $0x148] sm:$0xf]  ;;  %v3001_v8 = vld [vmem:[#allocation17 + $0xc0] sm:$0xf] }
 0x19c   :  { %1617 = vmatpush.bf16.msra.mxu2 %v2902_v2  ;;  %1609 = vmatpush.bf16.msra.mxu1 %v2738_v58  ;;  %v2705_v2 = vld [vmem:[#allocation16 + $0x58] sm:$0xf]  ;;  %v3356_v55 = vld [vmem:[#allocation17 + $0x164] sm:$0xf0]  ;;  %v3339_v9 = vld [vmem:[#allocation17 + $0xdc] sm:$0xf0] }
 0x19d   :  { %v2706_v4 = vor.u32 %v3262_v3, %v2705_v2  ;;  %v3074_v63 = vor.u32 %v3356_v55, %v3073_v54  ;;  %v3035_v2 = vld [vmem:[#allocation17 + $0x120] sm:$0xf0]  ;;  %v3041_v3 = vld [vmem:[#allocation17 + $0x108] sm:$0xf]  ;;  %v3002_v18 = vor.u32 %v3339_v9, %v3001_v8  ;;  %v3320_v41 = vld [vmem:[#allocation17 + $0x4c] sm:$0xf] }
 0x19e   :  { %1593 = vmatpush.bf16.msra.mxu0 %v2830_v21  ;;  %v3324_v40 = vld [vmem:[#allocation17 + $0x64] sm:$0xf0]  ;;  %v2947_v42 = vld [vmem:[#allocation17 + $0x68] sm:$0xf0]  ;;  %v3145_v55 = vld [vmem:[#allocation17 + $0x1d0] sm:$0xf] }
 0x19f   :  { %1582 = vmatpush.bf16.msrb.mxu3 %v2762_v44  ;;  %v3107_v44 = vld [vmem:[#allocation17 + $0x1a8] sm:$0xf0]  ;;  %v3361_v9 = vld [vmem:[#allocation17 + $0x194] sm:$0xf]  ;;  %2232 = dma.vmem_to_hbm [thread:$0]  %s2228_s29, 32, %s2230_s22, [#allocation22]  }
 0x1a0   :  { %1618 = vmatpush.bf16.msra.mxu2 %v2870_v13  ;;  %1610 = vmatpush.bf16.msra.mxu1 %v2706_v4  ;;  %v2673_v13 = vld [vmem:[#allocation16 + $0x18] sm:$0xf]  ;;  %v3110_v51 = vor.u32 %v3360_v43, %v3107_v44  ;;  %v3344_v4 = vld [vmem:[#allocation17 + $0x10c] sm:$0xf]  ;;  %v2905_v43 = vld [vmem:[#allocation17] sm:$0xf] }
 0x1a1   :  { %v2674_v16 = vor.u32 %v3254_v14, %v2673_v13  ;;  %v3003_v13 = vld [vmem:[#allocation17 + $0xe0] sm:$0xf0]  ;;  %v3009_v14 = vld [vmem:[#allocation17 + $0xc8] sm:$0xf]  ;;  %v2915_v54 = vld [vmem:[#allocation17 + $0x28] sm:$0xf0] }
 0x1a2   :  { %1594 = vmatpush.bf16.msra.mxu0 %v2798_v33  ;;  %v3130_v33 = vor.u32 %v3371_v24, %v3129_v23  ;;  %v3327_v24 = vld [vmem:[#allocation17 + $0x84] sm:$0xf]  ;;  %2243 = dma.vmem_to_hbm [thread:$0]  %s2239_s30, 32, %s2241_s1, [#allocation22]  }
 0x1a3   :  { %1583 = vmatpush.bf16.msrb.mxu3 %v2730_v56  ;;  %v3352_v56 = vld [vmem:[#allocation17 + $0x14c] sm:$0xf] }
 0x1a4   :  { %1619 = vmatpush.bf16.msra.mxu2 %v2838_v25  ;;  %1611 = vmatpush.bf16.msra.mxu1 %v2674_v16  ;;  %v3367_v25 = vld [vmem:[#allocation17 + $0x1c4] sm:$0xf]  ;;  %v3336_v16 = vld [vmem:[#allocation17 + $0xcc] sm:$0xf] }
 0x1a5   :  { %v3134_v34 = vor.u32 %v3367_v25, %v3131_v26  ;;  %v3014_v23 = vor.u32 %v3336_v16, %v3011_v17  ;;  %v2971_v25 = vld [vmem:[#allocation17 + $0xa0] sm:$0xf0]  ;;  %v2977_v26 = vld [vmem:[#allocation17 + $0x88] sm:$0xf]  ;;  %v3081_v17 = vld [vmem:[#allocation17 + $0x150] sm:$0xf] }
 0x1a6   :  { %1595 = vmatpush.bf16.msra.mxu0 %v2766_v45  ;;  %v2974_v31 = vor.u32 %v3327_v24, %v2971_v25  ;;  %v3358_v24 = vld [vmem:[#allocation17 + $0x174] sm:$0xf0]  ;;  %v3354_v25 = vld [vmem:[#allocation17 + $0x15c] sm:$0xf] }
 0x1a7   :  { %1584 = vmatpush.bf16.msrb.mxu3 %v2698_v0 }
 0x1a8   :  { %1620 = vmatpush.bf16.msra.mxu2 %v2806_v37  ;;  %v3138_v37 = vor.u32 %v3372_v28, %v3137_v27  ;;  %v3332_v27 = vld [vmem:[#allocation17 + $0xa4] sm:$0xf0]  ;;  %v3328_v28 = vld [vmem:[#allocation17 + $0x8c] sm:$0xf] }
 0x1a9   :  { %v2978_v35 = vor.u32 %v3332_v27, %v2977_v26  ;;  %v3091_v26 = vld [vmem:[#allocation17 + $0x178] sm:$0xf0] }
 0x1aa   :  { %1596 = vmatpush.bf16.msra.mxu0 %v2734_v57  ;;  %v3075_v57 = vld [vmem:[#allocation17 + $0x168] sm:$0xf0] }
 0x1ab   :  { %1585 = vmatpush.bf16.msrb.mxu3 %v2666_v11  ;;  %v3078_v0 = vor.u32 %v3352_v56, %v3075_v57  ;;  %v3046_v11 = vor.u32 %v3344_v4, %v3043_v5  ;;  %v3373_v56 = vld [vmem:[#allocation17 + $0x1ec] sm:$0xf0]  ;;  %v3369_v57 = vld [vmem:[#allocation17 + $0x1d4] sm:$0xf] }
 0x1ac   :  { %1621 = vmatpush.bf16.msra.mxu2 %v2774_v49  ;;  %v3355_v49 = vld [vmem:[#allocation17 + $0x15c] sm:$0xf0]  ;;  %v3113_v5 = vld [vmem:[#allocation17 + $0x190] sm:$0xf] }
 0x1ad   :  { %v3066_v58 = vor.u32 %v3355_v49, %v3065_v48  ;;  %v2907_v48 = vld [vmem:[#allocation17 + $0x20] sm:$0xf0]  ;;  %v2946_v49 = vor.u32 %v3324_v40, %v2945_v39  ;;  %v3059_v39 = vld [vmem:[#allocation17 + $0x138] sm:$0xf0] }
 0x1ae   :  { %1597 = vmatpush.bf16.msra.mxu0 %v2702_v59  ;;  %v3348_v59 = vld [vmem:[#allocation17 + $0x124] sm:$0xf0] }
 0x1af   :  { %v3042_v10 = vor.u32 %v3348_v59, %v3041_v3  ;;  %v3146_v59 = vor.u32 %v3373_v56, %v3145_v55  ;;  %v3333_v55 = vld [vmem:[#allocation17 + $0xac] sm:$0xf0] }
 0x1b0   :  { %1622 = vmatpush.bf16.msra.mxu2 %v2742_v60  ;;  %v3070_v60 = vor.u32 %v3351_v52, %v3067_v53  ;;  %v3316_v52 = vld [vmem:[#allocation17 + $0x24] sm:$0xf0]  ;;  %v3312_v53 = vld [vmem:[#allocation17 + $0xc] sm:$0xf] }
 0x1b1   :  { %v2918_v3 = vor.u32 %v3312_v53, %v2915_v54  ;;  %v2985_v54 = vld [vmem:[#allocation17 + $0x90] sm:$0xf] }
 0x1b2   :  { %1598 = vmatpush.bf16.msra.mxu0 %v2670_v15  ;;  %v3340_v15 = vld [vmem:[#allocation17 + $0xe4] sm:$0xf0] }
 0x1b4   :  { %1623 = vmatpush.bf16.msra.mxu2 %v2710_v7  ;;  %v3038_v7 = vor.u32 %v3343_v1, %v3035_v2  ;;  %v3155_v1 = vld [vmem:[#allocation17 + $0x1f8] sm:$0xf0] }
 0x1b8   :  { %1624 = vmatpush.bf16.msra.mxu2 %v2678_v19  ;;  %v3006_v19 = vor.u32 %v3335_v12, %v3003_v13  ;;  %v3366_v12 = vld [vmem:[#allocation17 + $0x1b4] sm:$0xf0]  ;;  %v3362_v13 = vld [vmem:[#allocation17 + $0x19c] sm:$0xf] }
 0x21e   :  { %v1118_v21 = vpop.f32.mrf.mxu2 }
 0x21f   :  { %v1119_v22 = vadd.f32 %v3398_v20, %v1118_v21  ;;  %v2969_v20 = vld [vmem:[#allocation17 + $0x80] sm:$0xf] }
 0x220   :  { %v3331_v21 = vld [vmem:[#allocation17 + $0x9c] sm:$0xf0] }
 0x221   :  { %v1122_v29 = vmax.f32 %v1119_v22, 0.0  ;;  %v3010_v22 = vor.u32 %v3340_v15, %v3009_v14  ;;  %v2970_v30 = vor.u32 %v3331_v21, %v2969_v20  ;;  %v3123_v14 = vld [vmem:[#allocation17 + $0x1b8] sm:$0xf0]  ;;  %v3353_v21 = vld [vmem:[#allocation17 + $0x154] sm:$0xf] }
 0x222   :  { %v3126_v20 = vor.u32 %v3362_v13, %v3123_v14  ;;  %v2921_v14 = vld [vmem:[#allocation17 + $0x10] sm:$0xf] }
 0x223   :  { %v3995_v32 = vpack.c.bf16 %v1122_v29, %v1122_v29  ;;  %v2979_v29 = vld [vmem:[#allocation17 + $0xa8] sm:$0xf0] }
 0x224   :  { %v2982_v36 = vor.u32 %v3328_v28, %v2979_v29  ;;  %v3049_v29 = vld [vmem:[#allocation17 + $0x110] sm:$0xf] }
 0x225   :  { %1534 = vmatmul.bf16.vlgmr.msra.gmra.mxu3 %v3995_v32  ;;  %1547 = vmatmul.bf16.vlgmr.msrb.gmra.mxu0 %v3995_v32 }
 0x226   :  { %1560 = vmatmul.bf16.vlgmr.msrb.gmra.mxu1 %v3995_v32  ;;  %1573 = vmatmul.bf16.vlgmr.msrb.gmra.mxu2 %v3995_v32  ;;  %v1120_v45 = vpop.f32.mrf.mxu2 }
 0x227   :  { %2059 = vmatpush.bf16.msra.mxu3 %v3130_v33  ;;  %2072 = vmatpush.bf16.msrb.mxu0 %v3134_v34  ;;  %v2937_v33 = vld [vmem:[#allocation17 + $0x40] sm:$0xf] }
 0x228   :  { %2085 = vmatpush.bf16.msrb.mxu1 %v3138_v37  ;;  %2098 = vmatpush.bf16.msrb.mxu2 %v3142_v38  ;;  %v3323_v34 = vld [vmem:[#allocation17 + $0x5c] sm:$0xf0]  ;;  %v3319_v37 = vld [vmem:[#allocation17 + $0x44] sm:$0xf] }
 0x229   :  { %v2939_v38 = vld [vmem:[#allocation17 + $0x60] sm:$0xf0]  ;;  %v2938_v44 = vor.u32 %v3323_v34, %v2937_v33  ;;  %v3094_v33 = vor.u32 %v3354_v25, %v3091_v26  ;;  %v3345_v34 = vld [vmem:[#allocation17 + $0x114] sm:$0xf] }
 0x22a   :  { %v2942_v45 = vor.u32 %v3319_v37, %v2939_v38  ;;  %v3350_v37 = vld [vmem:[#allocation17 + $0x134] sm:$0xf0]  ;;  %v3346_v38 = vld [vmem:[#allocation17 + $0x11c] sm:$0xf] }
 0x22b   :  { %2060 = vmatpush.bf16.msra.mxu3 %v3098_v46  ;;  %2073 = vmatpush.bf16.msrb.mxu0 %v3102_v47  ;;  %v3315_v46 = vld [vmem:[#allocation17 + $0x1c] sm:$0xf0]  ;;  %v3311_v47 = vld [vmem:[#allocation17 + $0x4] sm:$0xf] }
 0x22c   :  { %2086 = vmatpush.bf16.msrb.mxu1 %v3106_v50  ;;  %2099 = vmatpush.bf16.msrb.mxu2 %v3110_v51  ;;  %v2950_v50 = vor.u32 %v3320_v41, %v2947_v42  ;;  %v2913_v51 = vld [vmem:[#allocation17 + $0x8] sm:$0xf]  ;;  %v2906_v61 = vor.u32 %v3315_v46, %v2905_v43  ;;  %v2910_v62 = vor.u32 %v3311_v47, %v2907_v48  ;;  %v3017_v42 = vld [vmem:[#allocation17 + $0xd0] sm:$0xf]  ;;  %v3337_v46 = vld [vmem:[#allocation17 + $0xd4] sm:$0xf] }
 0x22d   :  { %v2914_v2 = vor.u32 %v3316_v52, %v2913_v51  ;;  %v3341_v43 = vld [vmem:[#allocation17 + $0xec] sm:$0xf0]  ;;  %v3019_v47 = vld [vmem:[#allocation17 + $0xf0] sm:$0xf0]  ;;  %v3025_v48 = vld [vmem:[#allocation17 + $0xd8] sm:$0xf] }
 0x22e   :  { %v3027_v51 = vld [vmem:[#allocation17 + $0xf8] sm:$0xf0]  ;;  %v3018_v52 = vor.u32 %v3341_v43, %v3017_v42  ;;  %v3022_v53 = vor.u32 %v3337_v46, %v3019_v47 }
 0x22f   :  { %2061 = vmatpush.bf16.msra.mxu3 %v3066_v58  ;;  %2074 = vmatpush.bf16.msrb.mxu0 %v3070_v60  ;;  %v3147_v58 = vld [vmem:[#allocation17 + $0x1f0] sm:$0xf0]  ;;  %v3153_v60 = vld [vmem:[#allocation17 + $0x1d8] sm:$0xf] }
 0x230   :  { %2087 = vmatpush.bf16.msrb.mxu1 %v3074_v63  ;;  %2100 = vmatpush.bf16.msrb.mxu2 %v3078_v0  ;;  %v3374_v63 = vld [vmem:[#allocation17 + $0x1f4] sm:$0xf0]  ;;  %v3370_v0 = vld [vmem:[#allocation17 + $0x1dc] sm:$0xf]  ;;  %v3150_v4 = vor.u32 %v3369_v57, %v3147_v58  ;;  %v3329_v58 = vld [vmem:[#allocation17 + $0x94] sm:$0xf] }
 0x231   :  { %v3158_v8 = vor.u32 %v3370_v0, %v3155_v1  ;;  %v2995_v0 = vld [vmem:[#allocation17 + $0xb8] sm:$0xf0]  ;;  %v2986_v1 = vor.u32 %v3333_v55, %v2985_v54 }
 0x233   :  { %2062 = vmatpush.bf16.msra.mxu3 %v3034_v6  ;;  %2075 = vmatpush.bf16.msrb.mxu0 %v3038_v7  ;;  %v3365_v6 = vld [vmem:[#allocation17 + $0x1ac] sm:$0xf0]  ;;  %v3154_v7 = vor.u32 %v3374_v63, %v3153_v60  ;;  %v2987_v60 = vld [vmem:[#allocation17 + $0xb0] sm:$0xf0]  ;;  %v3330_v63 = vld [vmem:[#allocation17 + $0x9c] sm:$0xf] }
 0x234   :  { %2088 = vmatpush.bf16.msrb.mxu1 %v3042_v10  ;;  %2101 = vmatpush.bf16.msrb.mxu2 %v3046_v11  ;;  %v3115_v10 = vld [vmem:[#allocation17 + $0x1b0] sm:$0xf0]  ;;  %v3121_v11 = vld [vmem:[#allocation17 + $0x198] sm:$0xf]  ;;  %v3114_v15 = vor.u32 %v3365_v6, %v3113_v5  ;;  %v2998_v5 = vor.u32 %v3330_v63, %v2995_v0 }
 0x235   :  { %1586 = vmatmul.bf16.vlgmr.msrb.gmra.mxu3 %v3995_v32  ;;  %1599 = vmatmul.bf16.vlgmr.msra.gmra.mxu0 %v3995_v32  ;;  %v3118_v16 = vor.u32 %v3361_v9, %v3115_v10  ;;  %v3321_v6 = vld [vmem:[#allocation17 + $0x54] sm:$0xf]  ;;  %v3326_v9 = vld [vmem:[#allocation17 + $0x74] sm:$0xf0]  ;;  %v3322_v10 = vld [vmem:[#allocation17 + $0x5c] sm:$0xf] }
 0x236   :  { %1612 = vmatmul.bf16.vlgmr.msra.gmra.mxu1 %v3995_v32  ;;  %1625 = vmatmul.bf16.vlgmr.msra.gmra.mxu2 %v3995_v32 }
 0x237   :  { %2063 = vmatpush.bf16.msra.mxu3 %v3002_v18  ;;  %2076 = vmatpush.bf16.msrb.mxu0 %v3006_v19  ;;  %v3357_v18 = vld [vmem:[#allocation17 + $0x16c] sm:$0xf0]  ;;  %v3122_v19 = vor.u32 %v3366_v12, %v3121_v11  ;;  %v2963_v11 = vld [vmem:[#allocation17 + $0x78] sm:$0xf0] }
 0x238   :  { %2089 = vmatpush.bf16.msrb.mxu1 %v3010_v22  ;;  %2102 = vmatpush.bf16.msrb.mxu2 %v3014_v23  ;;  %v3083_v22 = vld [vmem:[#allocation17 + $0x170] sm:$0xf0]  ;;  %v3089_v23 = vld [vmem:[#allocation17 + $0x158] sm:$0xf]  ;;  %v3082_v27 = vor.u32 %v3357_v18, %v3081_v17  ;;  %v2966_v17 = vor.u32 %v3322_v10, %v2963_v11 }
 0x239   :  { %v3086_v28 = vor.u32 %v3353_v21, %v3083_v22  ;;  %v3313_v18 = vld [vmem:[#allocation17 + $0x14] sm:$0xf]  ;;  %v3318_v21 = vld [vmem:[#allocation17 + $0x34] sm:$0xf0]  ;;  %v3314_v22 = vld [vmem:[#allocation17 + $0x1c] sm:$0xf] }
 0x23b   :  { %2064 = vmatpush.bf16.msra.mxu3 %v2970_v30  ;;  %2077 = vmatpush.bf16.msrb.mxu0 %v2974_v31  ;;  %v3349_v30 = vld [vmem:[#allocation17 + $0x12c] sm:$0xf0]  ;;  %v3090_v31 = vor.u32 %v3358_v24, %v3089_v23  ;;  %v2931_v23 = vld [vmem:[#allocation17 + $0x38] sm:$0xf0] }
 0x23c   :  { %2090 = vmatpush.bf16.msrb.mxu1 %v2978_v35  ;;  %2103 = vmatpush.bf16.msrb.mxu2 %v2982_v36  ;;  %v3051_v35 = vld [vmem:[#allocation17 + $0x130] sm:$0xf0]  ;;  %v3057_v36 = vld [vmem:[#allocation17 + $0x118] sm:$0xf]  ;;  %v3050_v40 = vor.u32 %v3349_v30, %v3049_v29 }
 0x23d   :  { %v3054_v41 = vor.u32 %v3345_v34, %v3051_v35 }
 0x23f   :  { %2065 = vmatpush.bf16.msra.mxu3 %v2938_v44  ;;  %2078 = vmatpush.bf16.msrb.mxu0 %v2942_v45  ;;  %v3058_v44 = vor.u32 %v3350_v37, %v3057_v36  ;;  %v3062_v45 = vor.u32 %v3346_v38, %v3059_v39 }
 0x240   :  { %2091 = vmatpush.bf16.msrb.mxu1 %v2946_v49  ;;  %2104 = vmatpush.bf16.msrb.mxu2 %v2950_v50  ;;  %v3342_v49 = vld [vmem:[#allocation17 + $0xf4] sm:$0xf0]  ;;  %v3338_v50 = vld [vmem:[#allocation17 + $0xdc] sm:$0xf] }
 0x241   :  { %v3026_v56 = vor.u32 %v3342_v49, %v3025_v48  ;;  %v3030_v57 = vor.u32 %v3338_v50, %v3027_v51 }
 0x243   :  { %2066 = vmatpush.bf16.msra.mxu3 %v2906_v61  ;;  %2079 = vmatpush.bf16.msrb.mxu0 %v2910_v62  ;;  %v2993_v61 = vld [vmem:[#allocation17 + $0x98] sm:$0xf] }
 0x244   :  { %2092 = vmatpush.bf16.msrb.mxu1 %v2914_v2  ;;  %2105 = vmatpush.bf16.msrb.mxu2 %v2918_v3  ;;  %v3334_v62 = vld [vmem:[#allocation17 + $0xb4] sm:$0xf0]  ;;  %v2990_v2 = vor.u32 %v3329_v58, %v2987_v60  ;;  %v2953_v3 = vld [vmem:[#allocation17 + $0x50] sm:$0xf] }
 0x246   :  { %2067 = vmatmul.bf16.vlgmr.msra.gmra.mxu3 %v3995_v32  ;;  %2080 = vmatmul.bf16.vlgmr.msrb.gmra.mxu0 %v3995_v32 }
 0x247   :  { %2111 = vmatpush.bf16.msrb.mxu3 %v3146_v59  ;;  %2124 = vmatpush.bf16.msra.mxu0 %v3150_v4  ;;  %v3325_v59 = vld [vmem:[#allocation17 + $0x6c] sm:$0xf0]  ;;  %v2994_v4 = vor.u32 %v3334_v62, %v2993_v61 }
 0x248   :  { %2137 = vmatpush.bf16.msra.mxu1 %v3154_v7  ;;  %2150 = vmatpush.bf16.msra.mxu2 %v3158_v8  ;;  %v2955_v7 = vld [vmem:[#allocation17 + $0x70] sm:$0xf0]  ;;  %v2961_v8 = vld [vmem:[#allocation17 + $0x58] sm:$0xf]  ;;  %v2954_v12 = vor.u32 %v3325_v59, %v2953_v3 }
 0x249   :  { %2093 = vmatmul.bf16.vlgmr.msrb.gmra.mxu1 %v3995_v32  ;;  %2106 = vmatmul.bf16.vlgmr.msrb.gmra.mxu2 %v3995_v32  ;;  %v2958_v13 = vor.u32 %v3321_v6, %v2955_v7  ;;  %v4033_v6 = vld [vmem:[#allocation19] sm:$0xff] }
 0x24a   :  { %v1724_v10 = vperm.slane %v4033_v6, 1  ;;  %v1725_v11 = vperm.slane %v4033_v6, 2 }
 0x24b   :  { %2112 = vmatpush.bf16.msrb.mxu3 %v3114_v15  ;;  %2125 = vmatpush.bf16.msra.mxu0 %v3118_v16  ;;  %v3317_v15 = vld [vmem:[#allocation17 + $0x2c] sm:$0xf0]  ;;  %v2962_v16 = vor.u32 %v3326_v9, %v2961_v8 }
 0x24c   :  { %2138 = vmatpush.bf16.msra.mxu1 %v3122_v19  ;;  %2151 = vmatpush.bf16.msra.mxu2 %v3126_v20  ;;  %v2923_v19 = vld [vmem:[#allocation17 + $0x30] sm:$0xf0]  ;;  %v2929_v20 = vld [vmem:[#allocation17 + $0x18] sm:$0xf]  ;;  %v2922_v24 = vor.u32 %v3317_v15, %v2921_v14 }
 0x24d   :  { %v2926_v25 = vor.u32 %v3313_v18, %v2923_v19  ;;  %v2930_v26 = vor.u32 %v3318_v21, %v2929_v20  ;;  %v1726_v19 = vperm.slane %v4033_v6, 3 }
 0x24f   :  { %2113 = vmatpush.bf16.msrb.mxu3 %v3082_v27  ;;  %2126 = vmatpush.bf16.msra.mxu0 %v3086_v28  ;;  %v2934_v27 = vor.u32 %v3314_v22, %v2931_v23 }
 0x250   :  { %2139 = vmatpush.bf16.msra.mxu1 %v3090_v31  ;;  %2152 = vmatpush.bf16.msra.mxu2 %v3094_v33 }
 0x253   :  { %2114 = vmatpush.bf16.msrb.mxu3 %v3050_v40  ;;  %2127 = vmatpush.bf16.msra.mxu0 %v3054_v41 }
 0x254   :  { %2140 = vmatpush.bf16.msra.mxu1 %v3058_v44  ;;  %2153 = vmatpush.bf16.msra.mxu2 %v3062_v45 }
 0x257   :  { %2115 = vmatpush.bf16.msrb.mxu3 %v3018_v52  ;;  %2128 = vmatpush.bf16.msra.mxu0 %v3022_v53 }
 0x258   :  { %2141 = vmatpush.bf16.msra.mxu1 %v3026_v56  ;;  %2154 = vmatpush.bf16.msra.mxu2 %v3030_v57 }
 0x25b   :  { %2116 = vmatpush.bf16.msrb.mxu3 %v2986_v1  ;;  %2129 = vmatpush.bf16.msra.mxu0 %v2990_v2 }
 0x25c   :  { %2142 = vmatpush.bf16.msra.mxu1 %v2994_v4  ;;  %2155 = vmatpush.bf16.msra.mxu2 %v2998_v5 }
 0x25f   :  { %2117 = vmatpush.bf16.msrb.mxu3 %v2954_v12  ;;  %2130 = vmatpush.bf16.msra.mxu0 %v2958_v13 }
 0x260   :  { %2143 = vmatpush.bf16.msra.mxu1 %v2962_v16  ;;  %2156 = vmatpush.bf16.msra.mxu2 %v2966_v17  ;;  %v1723_v17 = vperm.slane %v4033_v6, 0 }
 0x263   :  { %2118 = vmatpush.bf16.msrb.mxu3 %v2922_v24  ;;  %2131 = vmatpush.bf16.msra.mxu0 %v2926_v25 }
 0x264   :  { %2144 = vmatpush.bf16.msra.mxu1 %v2930_v26  ;;  %2157 = vmatpush.bf16.msra.mxu2 %v2934_v27 }
 0x266   :  { %2119 = vmatmul.bf16.vlgmr.msrb.gmra.mxu3 %v3995_v32  ;;  %2132 = vmatmul.bf16.vlgmr.msra.gmra.mxu0 %v3995_v32 }
 0x267   :  { %2145 = vmatmul.bf16.vlgmr.msra.gmra.mxu1 %v3995_v32  ;;  %2158 = vmatmul.bf16.vlgmr.msra.gmra.mxu2 %v3995_v32  ;;  %v1188_v32 = vld [vmem:[%s4064_s11] sm:$0xff]  ;;  %s3837_s11 = smov [#allocation24]  }
 0x268   :  { %v1191_v30 = vperm.slane %v1188_v32, 1  ;;  %v1192_v31 = vperm.slane %v1188_v32, 2  ;;  %v1190_v33 = vperm.slane %v1188_v32, 0  ;;  %v1193_v34 = vperm.slane %v1188_v32, 3  ;;  %s2249_s14 = sshll.u32 %s3837_s11, 4  ;;  %s2250_s14 = int_to_ptr.vmem [resolvable:$true] %s2249_s14 }
 0x269   :  { %v1195_v53 = vperm.slane %v1188_v32, 5  ;;  %v1196_v54 = vperm.slane %v1188_v32, 6  ;;  %v1194_v55 = vperm.slane %v1188_v32, 4  ;;  %v1197_v56 = vperm.slane %v1188_v32, 7 }
 0x2a2   :  { %v1548_v28 = vpop.f32.mrf.mxu0 }
 0x2a3   :  { %v1561_v29 = vpop.f32.mrf.mxu1  ;;  %v1549_v35 = vadd.f32 %v1548_v28, %v1191_v30 }
 0x2a4   :  { %v1562_v36 = vadd.f32 %v1561_v29, %v1192_v31 }
 0x2a5   :  { %v1638_v43 = vrot.slane %v1549_v35, 6 }
 0x2a6   :  { %v1639_v44 = vrot.slane %v1562_v36, 4 }
 0x2a8   :  { %v1535_v37 = vpop.f32.mrf.mxu3 }
 0x2a9   :  { %v1574_v38 = vpop.f32.mrf.mxu2  ;;  %v1536_v39 = vadd.f32 %v1535_v37, %v1190_v33 }
 0x2aa   :  { %v1575_v40 = vadd.f32 %v1574_v38, %v1193_v34  ;;  %v1550_v41 = vpop.f32.mrf.mxu0 }
 0x2ab   :  { %v1563_v42 = vpop.f32.mrf.mxu1  ;;  %v1645_v46 = vsel %vm1644_vm0, %v1536_v39, %v1638_v43 }
 0x2ac   :  { %v1640_v45 = vrot.slane %v1575_v40, 2 }
 0x2ae   :  { %v1647_v47 = vsel %vm1646_vm1, %v1639_v44, %v1640_v45  ;;  %v1728_v44 = vperm.slane %v4033_v6, 5  ;;  %v1729_v45 = vperm.slane %v4033_v6, 6 }
 0x2af   :  { %v1649_v48 = vsel %vm1648_vm2, %v1645_v46, %v1647_v47 }
 0x2b0   :  { %v1537_v49 = vpop.f32.mrf.mxu3  ;;  %1655 = vst [vmem:[#allocation24] sm:$0xff] %v1649_v48 }
 0x2b1   :  { %v1576_v50 = vpop.f32.mrf.mxu2 }
 0x2b2   :  { %v1600_v51 = vpop.f32.mrf.mxu0 }
 0x2b3   :  { %v1613_v52 = vpop.f32.mrf.mxu1  ;;  %v1601_v57 = vadd.f32 %v1600_v51, %v1195_v53  ;;  %v1727_v51 = vperm.slane %v4033_v6, 4  ;;  %v1730_v53 = vperm.slane %v4033_v6, 7 }
 0x2b4   :  { %v1614_v58 = vadd.f32 %v1613_v52, %v1196_v54 }
 0x2b5   :  { %v1641_v2 = vrot.slane %v1601_v57, 6 }
 0x2b6   :  { %v1642_v3 = vrot.slane %v1614_v58, 4 }
 0x2b8   :  { %v1587_v60 = vpop.f32.mrf.mxu3 }
 0x2b9   :  { %v1626_v61 = vpop.f32.mrf.mxu2  ;;  %v1588_v62 = vadd.f32 %v1587_v60, %v1194_v55 }
 0x2ba   :  { %v1627_v63 = vadd.f32 %v1626_v61, %v1197_v56  ;;  %v1602_v0 = vpop.f32.mrf.mxu0 }
 0x2bb   :  { %v1615_v1 = vpop.f32.mrf.mxu1  ;;  %v1650_v4 = vsel %vm1644_vm0, %v1588_v62, %v1641_v2 }
 0x2bc   :  { %v1643_v59 = vrot.slane %v1627_v63, 2 }
 0x2be   :  { %v1651_v5 = vsel %vm1646_vm1, %v1642_v3, %v1643_v59 }
 0x2bf   :  { %v1652_v7 = vsel %vm1648_vm2, %v1650_v4, %v1651_v5 }
 0x2c0   :  { %v1589_v8 = vpop.f32.mrf.mxu3  ;;  %1656 = vst [vmem:[#allocation24 + $0x8] sm:$0xff] %v1652_v7 }
 0x2c1   :  { %v1628_v9 = vpop.f32.mrf.mxu2  ;;  %2254 = dma.vmem_to_hbm [thread:$0]  %s2250_s14, 256, %s2252_s20, [#allocation25]  }
 0x2c3   :  { %v2081_v12 = vpop.f32.mrf.mxu0 }
 0x2c4   :  { %v2082_v13 = vadd.f32 %v2081_v12, %v1724_v10 }
 0x2c6   :  { %v2094_v14 = vpop.f32.mrf.mxu1  ;;  %v2164_v16 = vmul.f32 0.5, %v2082_v13 }
 0x2c7   :  { %v2095_v15 = vadd.f32 %v2094_v14, %v1725_v11 }
 0x2c8   :  { %v2173_v21 = vmul.f32 1.442695, %v2164_v16 }
 0x2c9   :  { %v2165_v18 = vmul.f32 0.5, %v2095_v15  ;;  %v2068_v20 = vpop.f32.mrf.mxu3 }
 0x2ca   :  { %v2069_v22 = vadd.f32 %v2068_v20, %v1723_v17  ;;  %3401 = vpow2.f32 %v2173_v21 }
 0x2cb   :  { %v2175_v24 = vmul.f32 1.442695, %v2165_v18  ;;  %v2083_v26 = vpop.f32.mrf.mxu0 }
 0x2cc   :  { %v2107_v23 = vpop.f32.mrf.mxu2  ;;  %v2163_v27 = vmul.f32 0.5, %v2069_v22 }
 0x2cd   :  { %v2108_v25 = vadd.f32 %v2107_v23, %v1726_v19  ;;  %3403 = vpow2.f32 %v2175_v24 }
 0x2ce   :  { %v2096_v32 = vpop.f32.mrf.mxu1  ;;  %v2171_v29 = vmul.f32 1.442695, %v2163_v27 }
 0x2cf   :  { %v2166_v28 = vmul.f32 0.5, %v2108_v25 }
 0x2d0   :  { %3405 = vpow2.f32 %v2171_v29  ;;  %v3402_v34 = vpop.eup %3401 }
 0x2d1   :  { %v2177_v30 = vmul.f32 1.442695, %v2166_v28  ;;  %v2070_v31 = vpop.f32.mrf.mxu3  ;;  %v2195_v38 = vrot.slane %v3402_v34, 6 }
 0x2d3   :  { %3407 = vpow2.f32 %v2177_v30  ;;  %v3404_v35 = vpop.eup %3403 }
 0x2d4   :  { %v2109_v33 = vpop.f32.mrf.mxu2  ;;  %v2196_v39 = vrot.slane %v3404_v35, 4 }
 0x2d6   :  { %v3406_v36 = vpop.eup %3405 }
 0x2d7   :  { %v2201_v42 = vsel %vm1644_vm0, %v3406_v36, %v2195_v38 }
 0x2d9   :  { %v3408_v37 = vpop.eup %3407 }
 0x2da   :  { %v2197_v40 = vrot.slane %v3408_v37, 2 }
 0x2dc   :  { %v2202_v41 = vsel %vm1646_vm1, %v2196_v39, %v2197_v40 }
 0x2dd   :  { %v2203_v43 = vsel %vm1648_vm2, %v2201_v42, %v2202_v41 }
 0x2de   :  { %2209 = vst [vmem:[#allocation26] sm:$0xff] %v2203_v43 }
 0x2e3   :  { %v2133_v46 = vpop.f32.mrf.mxu0 }
 0x2e4   :  { %v2134_v47 = vadd.f32 %v2133_v46, %v1728_v44  ;;  %v2146_v48 = vpop.f32.mrf.mxu1 }
 0x2e5   :  { %v2147_v49 = vadd.f32 %v2146_v48, %v1729_v45 }
 0x2e6   :  { %v2168_v50 = vmul.f32 0.5, %v2134_v47 }
 0x2e7   :  { %v2169_v52 = vmul.f32 0.5, %v2147_v49 }
 0x2e8   :  { %v2181_v55 = vmul.f32 1.442695, %v2168_v50 }
 0x2e9   :  { %v2120_v54 = vpop.f32.mrf.mxu3  ;;  %v2183_v58 = vmul.f32 1.442695, %v2169_v52 }
 0x2ea   :  { %v2121_v56 = vadd.f32 %v2120_v54, %v1727_v51  ;;  %v2159_v57 = vpop.f32.mrf.mxu2  ;;  %3409 = vpow2.f32 %v2181_v55 }
 0x2eb   :  { %v2160_v60 = vadd.f32 %v2159_v57, %v1730_v53  ;;  %v2135_v61 = vpop.f32.mrf.mxu0  ;;  %3411 = vpow2.f32 %v2183_v58 }
 0x2ec   :  { %v2167_v62 = vmul.f32 0.5, %v2121_v56  ;;  %v2148_v63 = vpop.f32.mrf.mxu1 }
 0x2ed   :  { %v2170_v0 = vmul.f32 0.5, %v2160_v60 }
 0x2ee   :  { %v2179_v1 = vmul.f32 1.442695, %v2167_v62 }
 0x2ef   :  { %v2185_v2 = vmul.f32 1.442695, %v2170_v0 }
 0x2f0   :  { %3413 = vpow2.f32 %v2179_v1  ;;  %v3410_v4 = vpop.eup %3409 }
 0x2f1   :  { %3415 = vpow2.f32 %v2185_v2  ;;  %v2122_v3 = vpop.f32.mrf.mxu3  ;;  %v3412_v5 = vpop.eup %3411  ;;  %v2198_v8 = vrot.slane %v3410_v4, 6 }
 0x2f2   :  { %v2161_v59 = vpop.f32.mrf.mxu2  ;;  %v2199_v9 = vrot.slane %v3412_v5, 4 }
 0x2f6   :  { %v3414_v6 = vpop.eup %3413 }
 0x2f7   :  { %v3416_v7 = vpop.eup %3415  ;;  %v2204_v12 = vsel %vm1644_vm0, %v3414_v6, %v2198_v8 }
 0x2f8   :  { %v2200_v10 = vrot.slane %v3416_v7, 2 }
 0x2fa   :  { %v2205_v11 = vsel %vm1646_vm1, %v2199_v9, %v2200_v10 }
 0x2fb   :  { %v2206_v13 = vsel %vm1648_vm2, %v2204_v12, %v2205_v11 }
 0x2fc   :  { %2210 = vst [vmem:[#allocation26 + $0x8] sm:$0xff] %v2206_v13 }
 0x2fd   :  { %2265 = dma.vmem_to_hbm [thread:$0]  %s2261_s2, 256, %s2263_s13, [#allocation25]  }
 0x2fe   :  { %3813 = dma.done.wait [#allocation4], 32  }
 0x2ff   :  { %3814 = vsyncadd [#allocation4], 4294967264 }
 0x300   :  { %3815 = dma.done.wait [#allocation22], 64  }
 0x301   :  { %3816 = vsyncadd [#allocation22], 4294967232 }
 0x302   :  { %3817 = dma.done.wait [#allocation25], 512  }
 0x303   :  { %3818 = vsyncadd [#allocation25], 4294966784 }
 0x304   :  { %2286 = vsyncpa [#allocation3], 1 }
 0x305   :  { %2287 = vsyncpa [#allocation6], 1 }
 0x306   :  { %2288 = vsyncpa [#allocation9], 1 }
 0x307   :  { %2289 = vsyncpa [#allocation12], 1 }
 0x308   :  { %2290 = vsyncpa [#allocation15], 1 }
 0x309   :  { %2291 = vsyncpa [#allocation18], 1 }
 0x30a   :  { %2292 = vsyncpa [#allocation4], 1 }
 0x30b   :  { %2293 = vsyncpa [#allocation22], 1 }
 0x30c   :  { %2294 = vsyncpa [#allocation25], 1 }

</bundles_post_ra>
